<compile_context>
chip_gen: v7x
topology: tpu7x:2x2x1
jax: 0.10.0
libtpu: 0.0.40
codegen_flags: <defaults>
</compile_context>

<pallas_src>
import functools

import jax
import jax.numpy as jnp
from jax import lax
from jax.experimental import pallas as pl
from jax.experimental.pallas import tpu as pltpu


def _round_up(x, m):
    return ((x + m - 1) // m) * m


def _bilstm_kernel(x_ref, wih_ref, whh_ref, b_ref, lens_ref,
                   out_ref, hlast_ref, gx_scr, h_scr, c_scr):
    """Length-masked LSTM, one grid step per direction (0 = fwd, 1 = bwd).

    x_ref    : (T, Bp, Ep)   shared time-major embedded inputs
    wih_ref  : (Ep, 4Hp)     this direction's input->gates weights (transposed, padded)
    whh_ref  : (Hp, 4Hp)     this direction's hidden->gates weights (transposed, padded)
    b_ref    : (1, 4Hp)      combined bias (b_ih + b_hh), padded per gate
    lens_ref : (Bp, 1)       int32 sequence lengths (0 for padded batch rows)
    out_ref  : (T, Bp, Hp)   per-step hidden in natural time order (zero where invalid)
    hlast_ref: (Bp, Hp)      hidden after the last valid step of each sequence
    """
    T, Bp, Ep = x_ref.shape
    Hp = hlast_ref.shape[-1]

    d = pl.program_id(0)
    reverse = d == 1

    # ---- pre-pass: hoisted input projection, one large MXU matmul ----------
    x_flat = x_ref[...].reshape(T * Bp, Ep)
    gx = jnp.dot(x_flat, wih_ref[...], preferred_element_type=jnp.float32)
    gx_scr[...] = (gx + b_ref[...]).reshape(T, Bp, 4 * Hp)

    h_scr[...] = jnp.zeros_like(h_scr)
    c_scr[...] = jnp.zeros_like(c_scr)

    whh = whh_ref[...]        # hoisted loop-invariant (Hp, 4Hp)
    lens = lens_ref[...]      # (Bp, 1)

    def step(s, carry):
        # forward walks t = 0..T-1; backward walks t = T-1..0 over the SAME input
        # (state stays zero until t < len, which is exactly the packed-reverse pass).
        t = jnp.where(reverse, T - 1 - s, s)

        h = h_scr[...]
        c = c_scr[...]

        # only the small recurrent matmul stays on the serial critical path
        gates = gx_scr[t] + jnp.dot(h, whh, preferred_element_type=jnp.float32)

        # gate slices are 128-lane aligned (Hp is a multiple of 128)
        i_g = jax.nn.sigmoid(gates[:, 0 * Hp:1 * Hp])
        f_g = jax.nn.sigmoid(gates[:, 1 * Hp:2 * Hp])
        g_g = jnp.tanh(gates[:, 2 * Hp:3 * Hp])
        o_g = jax.nn.sigmoid(gates[:, 3 * Hp:4 * Hp])

        valid = lens > t                              # (Bp, 1) bool
        valid_f = valid.astype(jnp.float32)

        c_cand = f_g * c + i_g * g_g
        h_cand = o_g * jnp.tanh(c_cand)

        c_scr[...] = jnp.where(valid, c_cand, c)
        h_scr[...] = jnp.where(valid, h_cand, h)
        out_ref[t] = h_cand * valid_f                 # full (Bp, Hp) unmasked store
        return carry

    lax.fori_loop(0, T, step, 0, unroll=True)
    hlast_ref[...] = h_scr[...]


def _bilstm_forward(x_tbe, wih, whh, bias, lens):
    """x_tbe: (T, Bp, Ep); wih: (2, Ep, 4Hp); whh: (2, Hp, 4Hp); bias: (2, 1, 4Hp);
    lens: (Bp, 1). Returns out (2, T, Bp, Hp) and hlast (2, Bp, Hp)."""
    T, Bp, Ep = x_tbe.shape
    Hp = whh.shape[1]
    FourHp = 4 * Hp

    out, hlast = pl.pallas_call(
        _bilstm_kernel,
        out_shape=(jax.ShapeDtypeStruct((2, T, Bp, Hp), jnp.float32),
                   jax.ShapeDtypeStruct((2, Bp, Hp), jnp.float32)),
        grid_spec=pltpu.PrefetchScalarGridSpec(
            num_scalar_prefetch=0,
            grid=(2,),                                     # fwd / bwd fused
            in_specs=[
                pl.BlockSpec((T, Bp, Ep), lambda d: (0, 0, 0)),        # x (shared)
                pl.BlockSpec((None, Ep, FourHp), lambda d: (d, 0, 0)),  # W_ih per dir
                pl.BlockSpec((None, Hp, FourHp), lambda d: (d, 0, 0)),  # W_hh per dir
                pl.BlockSpec((None, 1, FourHp), lambda d: (d, 0, 0)),   # bias per dir
                pl.BlockSpec((Bp, 1), lambda d: (0, 0)),                # lens (shared)
            ],
            out_specs=(
                pl.BlockSpec((None, T, Bp, Hp), lambda d: (d, 0, 0, 0)),
                pl.BlockSpec((None, Bp, Hp), lambda d: (d, 0, 0)),
            ),
            scratch_shapes=[
                pltpu.VMEM((T, Bp, FourHp), jnp.float32),   # hoisted input projection
                pltpu.VMEM((Bp, Hp), jnp.float32),          # h state
                pltpu.VMEM((Bp, Hp), jnp.float32),          # c state
            ]),
        compiler_params=pltpu.CompilerParams(
            dimension_semantics=("parallel",)),             # 2 TCs on v7x
    )(x_tbe, wih, whh, bias, lens)
    return out, hlast


class RNNEncoderPallas:
    """Parameter container + forward wrapper matching RNN_ENCODER semantics."""

    def __init__(self, ntoken, ninput=32, nhidden=32, key=jax.random.PRNGKey(0)):
        assert nhidden % 2 == 0
        self.ntoken = ntoken
        self.ninput = ninput
        self.nhidden = nhidden // 2          # per-direction hidden (bidirectional)
        H, E = self.nhidden, ninput

        # padded sizes for lane/sublane alignment inside the kernel
        self.Hp = _round_up(H, 128)
        self.Ep = _round_up(E, 128)
        Hp, Ep = self.Hp, self.Ep

        keys = jax.random.split(key, 9)
        initrange = 0.1
        emb = jax.random.uniform(keys[0], (ntoken, E), jnp.float32,
                                 -initrange, initrange)
        # pad embedding columns so the gather already produces lane-aligned inputs
        self.emb_table = jnp.zeros((ntoken, Ep), jnp.float32).at[:, :E].set(emb)

        stdv = 1.0 / (H ** 0.5)

        def u(k, shape):
            return jax.random.uniform(k, shape, jnp.float32, -stdv, stdv)

        # PyTorch LSTM params: weight_ih (4H, E), weight_hh (4H, H), biases (4H,)
        # Stored pre-transposed and gate-block padded: each of i/f/g/o occupies a
        # 128-lane-aligned block of width Hp (real values in lanes [0, H)).
        wih_list, whh_list, b_list = [], [], []
        for koff in (1, 5):                  # fwd, bwd
            w_ih = u(keys[koff + 0], (4 * H, E)).T    # (E, 4H)
            w_hh = u(keys[koff + 1], (4 * H, H)).T    # (H, 4H)
            b = (u(keys[koff + 2], (4 * H,)) + u(keys[koff + 3], (4 * H,)))[None, :]

            wih_p = jnp.zeros((Ep, 4 * Hp), jnp.float32)
            whh_p = jnp.zeros((Hp, 4 * Hp), jnp.float32)
            b_p = jnp.zeros((1, 4 * Hp), jnp.float32)
            for g in range(4):
                wih_p = wih_p.at[:E, g * Hp:g * Hp + H].set(w_ih[:, g * H:(g + 1) * H])
                whh_p = whh_p.at[:H, g * Hp:g * Hp + H].set(w_hh[:, g * H:(g + 1) * H])
                b_p = b_p.at[:, g * Hp:g * Hp + H].set(b[:, g * H:(g + 1) * H])
            wih_list.append(wih_p)
            whh_list.append(whh_p)
            b_list.append(b_p)

        self.wih = jnp.stack(wih_list)       # (2, Ep, 4Hp)
        self.whh = jnp.stack(whh_list)       # (2, Hp, 4Hp)
        self.bias = jnp.stack(b_list)        # (2, 1, 4Hp)

    @functools.partial(jax.jit, static_argnums=0)
    def forward(self, captions, cap_lens):
        """captions: (B, T) int32 token ids; cap_lens: (B,) int32 lengths.

        Returns (words_emb (B, 2H, T), sent_emb (B, 2H)).
        """
        B, T = captions.shape
        H, Hp = self.nhidden, self.Hp
        Bp = _round_up(B, 8)

        # time-major embedding gather (no float-tensor transpose, no reversal gather)
        emb_t = jnp.take(self.emb_table, captions.T, axis=0)     # (T, B, Ep)
        if Bp != B:
            emb_t = jnp.pad(emb_t, ((0, 0), (0, Bp - B), (0, 0)))
        lens = jnp.zeros((Bp, 1), jnp.int32).at[:B, 0].set(cap_lens.astype(jnp.int32))

        out, hlast = _bilstm_forward(emb_t, self.wih, self.whh, self.bias, lens)
        # out: (2, T, Bp, Hp) — both directions already in natural time order
        out_f = out[0, :, :B, :H]                                # (T, B, H)
        out_b = out[1, :, :B, :H]                                # (T, B, H)
        output = jnp.concatenate([out_f, out_b], axis=-1)        # (T, B, 2H)
        words_emb = jnp.transpose(output, (1, 2, 0))             # (B, 2H, T)
        sent_emb = jnp.concatenate([hlast[0, :B, :H], hlast[1, :B, :H]], axis=-1)
        return words_emb, sent_emb


if __name__ == "__main__":
    key = jax.random.PRNGKey(0)
    k_tok, k_model = jax.random.split(key)

    ntoken, ninput, nhidden = 50, 32, 32
    B, T = 2, 8

    captions = jax.random.randint(k_tok, (B, T), 0, ntoken, dtype=jnp.int32)
    cap_lens = jnp.array([8, 5], dtype=jnp.int32)   # max == T (matches pad_packed)

    model = RNNEncoderPallas(ntoken, ninput=ninput, nhidden=nhidden, key=k_model)
    words_emb, sent_emb = model.forward(captions, cap_lens)
    jax.block_until_ready((words_emb, sent_emb))

    assert words_emb.shape == (B, nhidden, T)
    assert sent_emb.shape == (B, nhidden)
    assert bool(jnp.all(jnp.isfinite(words_emb))) and bool(jnp.all(jnp.isfinite(sent_emb)))
    print("KERNEL_OK")
</pallas_src>

<mosaic_0001>
module attributes {stable_mosaic.version = 11 : i64} {
  func.func @_bilstm_kernel(%arg0: i32, %arg1: memref<8x8x128xf32, #tpu.memory_space<vmem>>, %arg2: memref<1x128x512xf32, #tpu.memory_space<vmem>>, %arg3: memref<1x128x512xf32, #tpu.memory_space<vmem>>, %arg4: memref<1x1x512xf32, #tpu.memory_space<vmem>>, %arg5: memref<8x1xi32, #tpu.memory_space<vmem>>, %arg6: memref<1x8x8x128xf32, #tpu.memory_space<vmem>>, %arg7: memref<1x8x128xf32, #tpu.memory_space<vmem>>, %arg8: memref<8x8x512xf32, #tpu.memory_space<vmem>>, %arg9: memref<8x128xf32, #tpu.memory_space<vmem>>, %arg10: memref<8x128xf32, #tpu.memory_space<vmem>>) attributes {dimension_semantics = [#tpu.dimension_semantics<parallel>], iteration_bounds = array<i64: 2>, scalar_prefetch = 0 : i64, scratch_operands = 3 : i64, tpu.core_type = #tpu.core_type<tc>, window_params = [{pipeline_mode = #tpu.pipeline_mode<synchronous>, transform_indices = @transform_0, window_bounds = array<i64: 8, 8, 128>}, {transform_indices = @transform_1, window_bounds = array<i64: 1, 128, 512>}, {transform_indices = @transform_2, window_bounds = array<i64: 1, 128, 512>}, {transform_indices = @transform_3, window_bounds = array<i64: 1, 1, 512>}, {pipeline_mode = #tpu.pipeline_mode<synchronous>, transform_indices = @transform_4, window_bounds = array<i64: 8, 1>}, {transform_indices = @transform_5, window_bounds = array<i64: 1, 8, 8, 128>}, {transform_indices = @transform_6, window_bounds = array<i64: 1, 8, 128>}]} {
    %c1_i32 = arith.constant 1 : i32
    %0 = arith.cmpi eq, %arg0, %c1_i32 : i32
    %c0 = arith.constant 0 : index
    %c0_0 = arith.constant 0 : index
    %c0_1 = arith.constant 0 : index
    %1 = vector.load %arg1[%c0, %c0_0, %c0_1] : memref<8x8x128xf32, #tpu.memory_space<vmem>>, vector<8x8x128xf32>
    %2 = vector.shape_cast %1 : vector<8x8x128xf32> to vector<64x128xf32>
    %c0_2 = arith.constant 0 : index
    %c0_3 = arith.constant 0 : index
    %c0_4 = arith.constant 0 : index
    %3 = vector.load %arg2[%c0_2, %c0_3, %c0_4] : memref<1x128x512xf32, #tpu.memory_space<vmem>>, vector<1x128x512xf32>
    %4 = vector.shape_cast %3 : vector<1x128x512xf32> to vector<128x512xf32>
    %cst = arith.constant dense<0.000000e+00> : vector<64x512xf32>
    %5 = tpu.matmul %2, %4, %cst {dimension_numbers = #tpu.dot_dimension_numbers<[1], [0], [0], [1], [0, 0, 1, 1], [], []>} : vector<64x128xf32>, vector<128x512xf32>, vector<64x512xf32> -> vector<64x512xf32>
    %c0_5 = arith.constant 0 : index
    %c0_6 = arith.constant 0 : index
    %c0_7 = arith.constant 0 : index
    %6 = vector.load %arg4[%c0_5, %c0_6, %c0_7] : memref<1x1x512xf32, #tpu.memory_space<vmem>>, vector<1x1x512xf32>
    %7 = vector.shape_cast %6 : vector<1x1x512xf32> to vector<1x512xf32>
    %8 = vector.broadcast %7 : vector<1x512xf32> to vector<64x512xf32>
    %9 = arith.addf %5, %8 : vector<64x512xf32>
    %10 = vector.shape_cast %9 : vector<64x512xf32> to vector<8x8x512xf32>
    %c0_8 = arith.constant 0 : index
    %c0_9 = arith.constant 0 : index
    %c0_10 = arith.constant 0 : index
    %11 = vector.load %arg8[%c0_8, %c0_9, %c0_10] : memref<8x8x512xf32, #tpu.memory_space<vmem>>, vector<8x8x512xf32>
    tpu.vector_store %arg8[%c0_8, %c0_9, %c0_10], %10 {strides = array<i32>} : memref<8x8x512xf32, #tpu.memory_space<vmem>>, vector<8x8x512xf32>,
    %cst_11 = arith.constant 0.000000e+00 : f32
    %12 = vector.broadcast %cst_11 : f32 to vector<8x128xf32>
    %c0_12 = arith.constant 0 : index
    %c0_13 = arith.constant 0 : index
    %13 = vector.load %arg9[%c0_12, %c0_13] : memref<8x128xf32, #tpu.memory_space<vmem>>, vector<8x128xf32>
    tpu.vector_store %arg9[%c0_12, %c0_13], %12 {strides = array<i32>} : memref<8x128xf32, #tpu.memory_space<vmem>>, vector<8x128xf32>,
    %cst_14 = arith.constant 0.000000e+00 : f32
    %14 = vector.broadcast %cst_14 : f32 to vector<8x128xf32>
    %c0_15 = arith.constant 0 : index
    %c0_16 = arith.constant 0 : index
    %15 = vector.load %arg10[%c0_15, %c0_16] : memref<8x128xf32, #tpu.memory_space<vmem>>, vector<8x128xf32>
    tpu.vector_store %arg10[%c0_15, %c0_16], %14 {strides = array<i32>} : memref<8x128xf32, #tpu.memory_space<vmem>>, vector<8x128xf32>,
    %c0_17 = arith.constant 0 : index
    %c0_18 = arith.constant 0 : index
    %c0_19 = arith.constant 0 : index
    %16 = vector.load %arg3[%c0_17, %c0_18, %c0_19] : memref<1x128x512xf32, #tpu.memory_space<vmem>>, vector<1x128x512xf32>
    %17 = vector.shape_cast %16 : vector<1x128x512xf32> to vector<128x512xf32>
    %c0_20 = arith.constant 0 : index
    %c0_21 = arith.constant 0 : index
    %18 = vector.load %arg5[%c0_20, %c0_21] : memref<8x1xi32, #tpu.memory_space<vmem>>, vector<8x1xi32>
    %c0_i32 = arith.constant 0 : i32
    %c7_i32 = arith.constant 7 : i32
    %19 = arith.subi %c7_i32, %c0_i32 : i32
    %20 = arith.select %0, %19, %c0_i32 : i32
    %c0_22 = arith.constant 0 : index
    %c0_23 = arith.constant 0 : index
    %21 = vector.load %arg9[%c0_22, %c0_23] : memref<8x128xf32, #tpu.memory_space<vmem>>, vector<8x128xf32>
    %c0_24 = arith.constant 0 : index
    %c0_25 = arith.constant 0 : index
    %22 = vector.load %arg10[%c0_24, %c0_25] : memref<8x128xf32, #tpu.memory_space<vmem>>, vector<8x128xf32>
    %23 = arith.index_cast %20 : i32 to index
    %c0_26 = arith.constant 0 : index
    %c0_27 = arith.constant 0 : index
    %24 = vector.load %arg8[%23, %c0_26, %c0_27] : memref<8x8x512xf32, #tpu.memory_space<vmem>>, vector<1x8x512xf32>
    %25 = vector.shape_cast %24 : vector<1x8x512xf32> to vector<8x512xf32>
    %cst_28 = arith.constant dense<0.000000e+00> : vector<8x512xf32>
    %26 = tpu.matmul %21, %17, %cst_28 {dimension_numbers = #tpu.dot_dimension_numbers<[1], [0], [0], [1], [0, 0, 1, 1], [], []>} : vector<8x128xf32>, vector<128x512xf32>, vector<8x512xf32> -> vector<8x512xf32>
    %27 = arith.addf %25, %26 : vector<8x512xf32>
    %28 = vector.extract_strided_slice %27 {offsets = [0, 0], sizes = [8, 128], strides = [1, 1]} : vector<8x512xf32> to vector<8x128xf32>
    %29 = arith.negf %28 : vector<8x128xf32>
    %30 = math.exp %29 : vector<8x128xf32>
    %cst_29 = arith.constant 1.000000e+00 : f32
    %31 = vector.broadcast %cst_29 : f32 to vector<8x128xf32>
    %32 = arith.addf %31, %30 : vector<8x128xf32>
    %33 = arith.divf %31, %32 : vector<8x128xf32>
    %34 = vector.extract_strided_slice %27 {offsets = [0, 128], sizes = [8, 128], strides = [1, 1]} : vector<8x512xf32> to vector<8x128xf32>
    %35 = arith.negf %34 : vector<8x128xf32>
    %36 = math.exp %35 : vector<8x128xf32>
    %cst_30 = arith.constant 1.000000e+00 : f32
    %37 = vector.broadcast %cst_30 : f32 to vector<8x128xf32>
    %38 = arith.addf %37, %36 : vector<8x128xf32>
    %39 = arith.divf %37, %38 : vector<8x128xf32>
    %40 = vector.extract_strided_slice %27 {offsets = [0, 256], sizes = [8, 128], strides = [1, 1]} : vector<8x512xf32> to vector<8x128xf32>
    %41 = math.tanh %40 : vector<8x128xf32>
    %42 = vector.extract_strided_slice %27 {offsets = [0, 384], sizes = [8, 128], strides = [1, 1]} : vector<8x512xf32> to vector<8x128xf32>
    %43 = arith.negf %42 : vector<8x128xf32>
    %44 = math.exp %43 : vector<8x128xf32>
    %cst_31 = arith.constant 1.000000e+00 : f32
    %45 = vector.broadcast %cst_31 : f32 to vector<8x128xf32>
    %46 = arith.addf %45, %44 : vector<8x128xf32>
    %47 = arith.divf %45, %46 : vector<8x128xf32>
    %48 = vector.broadcast %20 : i32 to vector<8x1xi32>
    %49 = arith.cmpi sgt, %18, %48 : vector<8x1xi32>
    %50 = arith.extui %49 : vector<8x1xi1> to vector<8x1xi32>
    %51 = arith.sitofp %50 : vector<8x1xi32> to vector<8x1xf32>
    %52 = arith.mulf %39, %22 : vector<8x128xf32>
    %53 = arith.mulf %33, %41 : vector<8x128xf32>
    %54 = arith.addf %52, %53 : vector<8x128xf32>
    %55 = math.tanh %54 : vector<8x128xf32>
    %56 = arith.mulf %47, %55 : vector<8x128xf32>
    %57 = vector.shape_cast %49 : vector<8x1xi1> to vector<8x1xi1>
    %58 = vector.broadcast %57 : vector<8x1xi1> to vector<8x128xi1>
    %59 = arith.select %58, %54, %22 : vector<8x128xi1>, vector<8x128xf32>
    %c0_32 = arith.constant 0 : index
    %c0_33 = arith.constant 0 : index
    %60 = vector.load %arg10[%c0_32, %c0_33] : memref<8x128xf32, #tpu.memory_space<vmem>>, vector<8x128xf32>
    tpu.vector_store %arg10[%c0_32, %c0_33], %59 {strides = array<i32>} : memref<8x128xf32, #tpu.memory_space<vmem>>, vector<8x128xf32>,
    %61 = vector.shape_cast %49 : vector<8x1xi1> to vector<8x1xi1>
    %62 = vector.broadcast %61 : vector<8x1xi1> to vector<8x128xi1>
    %63 = arith.select %62, %56, %21 : vector<8x128xi1>, vector<8x128xf32>
    %c0_34 = arith.constant 0 : index
    %c0_35 = arith.constant 0 : index
    %64 = vector.load %arg9[%c0_34, %c0_35] : memref<8x128xf32, #tpu.memory_space<vmem>>, vector<8x128xf32>
    tpu.vector_store %arg9[%c0_34, %c0_35], %63 {strides = array<i32>} : memref<8x128xf32, #tpu.memory_space<vmem>>, vector<8x128xf32>,
    %65 = vector.broadcast %51 : vector<8x1xf32> to vector<8x128xf32>
    %66 = arith.mulf %56, %65 : vector<8x128xf32>
    %c0_36 = arith.constant 0 : index
    %67 = arith.index_cast %20 : i32 to index
    %c0_37 = arith.constant 0 : index
    %c0_38 = arith.constant 0 : index
    %68 = vector.load %arg6[%c0_36, %67, %c0_37, %c0_38] : memref<1x8x8x128xf32, #tpu.memory_space<vmem>>, vector<1x1x8x128xf32>
    %69 = vector.shape_cast %68 : vector<1x1x8x128xf32> to vector<8x128xf32>
    %70 = vector.shape_cast %66 : vector<8x128xf32> to vector<1x1x8x128xf32>
    tpu.vector_store %arg6[%c0_36, %67, %c0_37, %c0_38], %70 {strides = array<i32>} : memref<1x8x8x128xf32, #tpu.memory_space<vmem>>, vector<1x1x8x128xf32>,
    %c1_i32_39 = arith.constant 1 : i32
    %c7_i32_40 = arith.constant 7 : i32
    %71 = arith.subi %c7_i32_40, %c1_i32_39 : i32
    %72 = arith.select %0, %71, %c1_i32_39 : i32
    %c0_41 = arith.constant 0 : index
    %c0_42 = arith.constant 0 : index
    %73 = vector.load %arg9[%c0_41, %c0_42] : memref<8x128xf32, #tpu.memory_space<vmem>>, vector<8x128xf32>
    %c0_43 = arith.constant 0 : index
    %c0_44 = arith.constant 0 : index
    %74 = vector.load %arg10[%c0_43, %c0_44] : memref<8x128xf32, #tpu.memory_space<vmem>>, vector<8x128xf32>
    %75 = arith.index_cast %72 : i32 to index
    %c0_45 = arith.constant 0 : index
    %c0_46 = arith.constant 0 : index
    %76 = vector.load %arg8[%75, %c0_45, %c0_46] : memref<8x8x512xf32, #tpu.memory_space<vmem>>, vector<1x8x512xf32>
    %77 = vector.shape_cast %76 : vector<1x8x512xf32> to vector<8x512xf32>
    %cst_47 = arith.constant dense<0.000000e+00> : vector<8x512xf32>
    %78 = tpu.matmul %73, %17, %cst_47 {dimension_numbers = #tpu.dot_dimension_numbers<[1], [0], [0], [1], [0, 0, 1, 1], [], []>} : vector<8x128xf32>, vector<128x512xf32>, vector<8x512xf32> -> vector<8x512xf32>
    %79 = arith.addf %77, %78 : vector<8x512xf32>
    %80 = vector.extract_strided_slice %79 {offsets = [0, 0], sizes = [8, 128], strides = [1, 1]} : vector<8x512xf32> to vector<8x128xf32>
    %81 = arith.negf %80 : vector<8x128xf32>
    %82 = math.exp %81 : vector<8x128xf32>
    %cst_48 = arith.constant 1.000000e+00 : f32
    %83 = vector.broadcast %cst_48 : f32 to vector<8x128xf32>
    %84 = arith.addf %83, %82 : vector<8x128xf32>
    %85 = arith.divf %83, %84 : vector<8x128xf32>
    %86 = vector.extract_strided_slice %79 {offsets = [0, 128], sizes = [8, 128], strides = [1, 1]} : vector<8x512xf32> to vector<8x128xf32>
    %87 = arith.negf %86 : vector<8x128xf32>
    %88 = math.exp %87 : vector<8x128xf32>
    %cst_49 = arith.constant 1.000000e+00 : f32
    %89 = vector.broadcast %cst_49 : f32 to vector<8x128xf32>
    %90 = arith.addf %89, %88 : vector<8x128xf32>
    %91 = arith.divf %89, %90 : vector<8x128xf32>
    %92 = vector.extract_strided_slice %79 {offsets = [0, 256], sizes = [8, 128], strides = [1, 1]} : vector<8x512xf32> to vector<8x128xf32>
    %93 = math.tanh %92 : vector<8x128xf32>
    %94 = vector.extract_strided_slice %79 {offsets = [0, 384], sizes = [8, 128], strides = [1, 1]} : vector<8x512xf32> to vector<8x128xf32>
    %95 = arith.negf %94 : vector<8x128xf32>
    %96 = math.exp %95 : vector<8x128xf32>
    %cst_50 = arith.constant 1.000000e+00 : f32
    %97 = vector.broadcast %cst_50 : f32 to vector<8x128xf32>
    %98 = arith.addf %97, %96 : vector<8x128xf32>
    %99 = arith.divf %97, %98 : vector<8x128xf32>
    %100 = vector.broadcast %72 : i32 to vector<8x1xi32>
    %101 = arith.cmpi sgt, %18, %100 : vector<8x1xi32>
    %102 = arith.extui %101 : vector<8x1xi1> to vector<8x1xi32>
    %103 = arith.sitofp %102 : vector<8x1xi32> to vector<8x1xf32>
    %104 = arith.mulf %91, %74 : vector<8x128xf32>
    %105 = arith.mulf %85, %93 : vector<8x128xf32>
    %106 = arith.addf %104, %105 : vector<8x128xf32>
    %107 = math.tanh %106 : vector<8x128xf32>
    %108 = arith.mulf %99, %107 : vector<8x128xf32>
    %109 = vector.shape_cast %101 : vector<8x1xi1> to vector<8x1xi1>
    %110 = vector.broadcast %109 : vector<8x1xi1> to vector<8x128xi1>
    %111 = arith.select %110, %106, %74 : vector<8x128xi1>, vector<8x128xf32>
    %c0_51 = arith.constant 0 : index
    %c0_52 = arith.constant 0 : index
    %112 = vector.load %arg10[%c0_51, %c0_52] : memref<8x128xf32, #tpu.memory_space<vmem>>, vector<8x128xf32>
    tpu.vector_store %arg10[%c0_51, %c0_52], %111 {strides = array<i32>} : memref<8x128xf32, #tpu.memory_space<vmem>>, vector<8x128xf32>,
    %113 = vector.shape_cast %101 : vector<8x1xi1> to vector<8x1xi1>
    %114 = vector.broadcast %113 : vector<8x1xi1> to vector<8x128xi1>
    %115 = arith.select %114, %108, %73 : vector<8x128xi1>, vector<8x128xf32>
    %c0_53 = arith.constant 0 : index
    %c0_54 = arith.constant 0 : index
    %116 = vector.load %arg9[%c0_53, %c0_54] : memref<8x128xf32, #tpu.memory_space<vmem>>, vector<8x128xf32>
    tpu.vector_store %arg9[%c0_53, %c0_54], %115 {strides = array<i32>} : memref<8x128xf32, #tpu.memory_space<vmem>>, vector<8x128xf32>,
    %117 = vector.broadcast %103 : vector<8x1xf32> to vector<8x128xf32>
    %118 = arith.mulf %108, %117 : vector<8x128xf32>
    %c0_55 = arith.constant 0 : index
    %119 = arith.index_cast %72 : i32 to index
    %c0_56 = arith.constant 0 : index
    %c0_57 = arith.constant 0 : index
    %120 = vector.load %arg6[%c0_55, %119, %c0_56, %c0_57] : memref<1x8x8x128xf32, #tpu.memory_space<vmem>>, vector<1x1x8x128xf32>
    %121 = vector.shape_cast %120 : vector<1x1x8x128xf32> to vector<8x128xf32>
    %122 = vector.shape_cast %118 : vector<8x128xf32> to vector<1x1x8x128xf32>
    tpu.vector_store %arg6[%c0_55, %119, %c0_56, %c0_57], %122 {strides = array<i32>} : memref<1x8x8x128xf32, #tpu.memory_space<vmem>>, vector<1x1x8x128xf32>,
    %c2_i32 = arith.constant 2 : i32
    %c7_i32_58 = arith.constant 7 : i32
    %123 = arith.subi %c7_i32_58, %c2_i32 : i32
    %124 = arith.select %0, %123, %c2_i32 : i32
    %c0_59 = arith.constant 0 : index
    %c0_60 = arith.constant 0 : index
    %125 = vector.load %arg9[%c0_59, %c0_60] : memref<8x128xf32, #tpu.memory_space<vmem>>, vector<8x128xf32>
    %c0_61 = arith.constant 0 : index
    %c0_62 = arith.constant 0 : index
    %126 = vector.load %arg10[%c0_61, %c0_62] : memref<8x128xf32, #tpu.memory_space<vmem>>, vector<8x128xf32>
    %127 = arith.index_cast %124 : i32 to index
    %c0_63 = arith.constant 0 : index
    %c0_64 = arith.constant 0 : index
    %128 = vector.load %arg8[%127, %c0_63, %c0_64] : memref<8x8x512xf32, #tpu.memory_space<vmem>>, vector<1x8x512xf32>
    %129 = vector.shape_cast %128 : vector<1x8x512xf32> to vector<8x512xf32>
    %cst_65 = arith.constant dense<0.000000e+00> : vector<8x512xf32>
    %130 = tpu.matmul %125, %17, %cst_65 {dimension_numbers = #tpu.dot_dimension_numbers<[1], [0], [0], [1], [0, 0, 1, 1], [], []>} : vector<8x128xf32>, vector<128x512xf32>, vector<8x512xf32> -> vector<8x512xf32>
    %131 = arith.addf %129, %130 : vector<8x512xf32>
    %132 = vector.extract_strided_slice %131 {offsets = [0, 0], sizes = [8, 128], strides = [1, 1]} : vector<8x512xf32> to vector<8x128xf32>
    %133 = arith.negf %132 : vector<8x128xf32>
    %134 = math.exp %133 : vector<8x128xf32>
    %cst_66 = arith.constant 1.000000e+00 : f32
    %135 = vector.broadcast %cst_66 : f32 to vector<8x128xf32>
    %136 = arith.addf %135, %134 : vector<8x128xf32>
    %137 = arith.divf %135, %136 : vector<8x128xf32>
    %138 = vector.extract_strided_slice %131 {offsets = [0, 128], sizes = [8, 128], strides = [1, 1]} : vector<8x512xf32> to vector<8x128xf32>
    %139 = arith.negf %138 : vector<8x128xf32>
    %140 = math.exp %139 : vector<8x128xf32>
    %cst_67 = arith.constant 1.000000e+00 : f32
    %141 = vector.broadcast %cst_67 : f32 to vector<8x128xf32>
    %142 = arith.addf %141, %140 : vector<8x128xf32>
    %143 = arith.divf %141, %142 : vector<8x128xf32>
    %144 = vector.extract_strided_slice %131 {offsets = [0, 256], sizes = [8, 128], strides = [1, 1]} : vector<8x512xf32> to vector<8x128xf32>
    %145 = math.tanh %144 : vector<8x128xf32>
    %146 = vector.extract_strided_slice %131 {offsets = [0, 384], sizes = [8, 128], strides = [1, 1]} : vector<8x512xf32> to vector<8x128xf32>
    %147 = arith.negf %146 : vector<8x128xf32>
    %148 = math.exp %147 : vector<8x128xf32>
    %cst_68 = arith.constant 1.000000e+00 : f32
    %149 = vector.broadcast %cst_68 : f32 to vector<8x128xf32>
    %150 = arith.addf %149, %148 : vector<8x128xf32>
    %151 = arith.divf %149, %150 : vector<8x128xf32>
    %152 = vector.broadcast %124 : i32 to vector<8x1xi32>
    %153 = arith.cmpi sgt, %18, %152 : vector<8x1xi32>
    %154 = arith.extui %153 : vector<8x1xi1> to vector<8x1xi32>
    %155 = arith.sitofp %154 : vector<8x1xi32> to vector<8x1xf32>
    %156 = arith.mulf %143, %126 : vector<8x128xf32>
    %157 = arith.mulf %137, %145 : vector<8x128xf32>
    %158 = arith.addf %156, %157 : vector<8x128xf32>
    %159 = math.tanh %158 : vector<8x128xf32>
    %160 = arith.mulf %151, %159 : vector<8x128xf32>
    %161 = vector.shape_cast %153 : vector<8x1xi1> to vector<8x1xi1>
    %162 = vector.broadcast %161 : vector<8x1xi1> to vector<8x128xi1>
    %163 = arith.select %162, %158, %126 : vector<8x128xi1>, vector<8x128xf32>
    %c0_69 = arith.constant 0 : index
    %c0_70 = arith.constant 0 : index
    %164 = vector.load %arg10[%c0_69, %c0_70] : memref<8x128xf32, #tpu.memory_space<vmem>>, vector<8x128xf32>
    tpu.vector_store %arg10[%c0_69, %c0_70], %163 {strides = array<i32>} : memref<8x128xf32, #tpu.memory_space<vmem>>, vector<8x128xf32>,
    %165 = vector.shape_cast %153 : vector<8x1xi1> to vector<8x1xi1>
    %166 = vector.broadcast %165 : vector<8x1xi1> to vector<8x128xi1>
    %167 = arith.select %166, %160, %125 : vector<8x128xi1>, vector<8x128xf32>
    %c0_71 = arith.constant 0 : index
    %c0_72 = arith.constant 0 : index
    %168 = vector.load %arg9[%c0_71, %c0_72] : memref<8x128xf32, #tpu.memory_space<vmem>>, vector<8x128xf32>
    tpu.vector_store %arg9[%c0_71, %c0_72], %167 {strides = array<i32>} : memref<8x128xf32, #tpu.memory_space<vmem>>, vector<8x128xf32>,
    %169 = vector.broadcast %155 : vector<8x1xf32> to vector<8x128xf32>
    %170 = arith.mulf %160, %169 : vector<8x128xf32>
    %c0_73 = arith.constant 0 : index
    %171 = arith.index_cast %124 : i32 to index
    %c0_74 = arith.constant 0 : index
    %c0_75 = arith.constant 0 : index
    %172 = vector.load %arg6[%c0_73, %171, %c0_74, %c0_75] : memref<1x8x8x128xf32, #tpu.memory_space<vmem>>, vector<1x1x8x128xf32>
    %173 = vector.shape_cast %172 : vector<1x1x8x128xf32> to vector<8x128xf32>
    %174 = vector.shape_cast %170 : vector<8x128xf32> to vector<1x1x8x128xf32>
    tpu.vector_store %arg6[%c0_73, %171, %c0_74, %c0_75], %174 {strides = array<i32>} : memref<1x8x8x128xf32, #tpu.memory_space<vmem>>, vector<1x1x8x128xf32>,
    %c3_i32 = arith.constant 3 : i32
    %c7_i32_76 = arith.constant 7 : i32
    %175 = arith.subi %c7_i32_76, %c3_i32 : i32
    %176 = arith.select %0, %175, %c3_i32 : i32
    %c0_77 = arith.constant 0 : index
    %c0_78 = arith.constant 0 : index
    %177 = vector.load %arg9[%c0_77, %c0_78] : memref<8x128xf32, #tpu.memory_space<vmem>>, vector<8x128xf32>
    %c0_79 = arith.constant 0 : index
    %c0_80 = arith.constant 0 : index
    %178 = vector.load %arg10[%c0_79, %c0_80] : memref<8x128xf32, #tpu.memory_space<vmem>>, vector<8x128xf32>
    %179 = arith.index_cast %176 : i32 to index
    %c0_81 = arith.constant 0 : index
    %c0_82 = arith.constant 0 : index
    %180 = vector.load %arg8[%179, %c0_81, %c0_82] : memref<8x8x512xf32, #tpu.memory_space<vmem>>, vector<1x8x512xf32>
    %181 = vector.shape_cast %180 : vector<1x8x512xf32> to vector<8x512xf32>
    %cst_83 = arith.constant dense<0.000000e+00> : vector<8x512xf32>
    %182 = tpu.matmul %177, %17, %cst_83 {dimension_numbers = #tpu.dot_dimension_numbers<[1], [0], [0], [1], [0, 0, 1, 1], [], []>} : vector<8x128xf32>, vector<128x512xf32>, vector<8x512xf32> -> vector<8x512xf32>
    %183 = arith.addf %181, %182 : vector<8x512xf32>
    %184 = vector.extract_strided_slice %183 {offsets = [0, 0], sizes = [8, 128], strides = [1, 1]} : vector<8x512xf32> to vector<8x128xf32>
    %185 = arith.negf %184 : vector<8x128xf32>
    %186 = math.exp %185 : vector<8x128xf32>
    %cst_84 = arith.constant 1.000000e+00 : f32
    %187 = vector.broadcast %cst_84 : f32 to vector<8x128xf32>
    %188 = arith.addf %187, %186 : vector<8x128xf32>
    %189 = arith.divf %187, %188 : vector<8x128xf32>
    %190 = vector.extract_strided_slice %183 {offsets = [0, 128], sizes = [8, 128], strides = [1, 1]} : vector<8x512xf32> to vector<8x128xf32>
    %191 = arith.negf %190 : vector<8x128xf32>
    %192 = math.exp %191 : vector<8x128xf32>
    %cst_85 = arith.constant 1.000000e+00 : f32
    %193 = vector.broadcast %cst_85 : f32 to vector<8x128xf32>
    %194 = arith.addf %193, %192 : vector<8x128xf32>
    %195 = arith.divf %193, %194 : vector<8x128xf32>
    %196 = vector.extract_strided_slice %183 {offsets = [0, 256], sizes = [8, 128], strides = [1, 1]} : vector<8x512xf32> to vector<8x128xf32>
    %197 = math.tanh %196 : vector<8x128xf32>
    %198 = vector.extract_strided_slice %183 {offsets = [0, 384], sizes = [8, 128], strides = [1, 1]} : vector<8x512xf32> to vector<8x128xf32>
    %199 = arith.negf %198 : vector<8x128xf32>
    %200 = math.exp %199 : vector<8x128xf32>
    %cst_86 = arith.constant 1.000000e+00 : f32
    %201 = vector.broadcast %cst_86 : f32 to vector<8x128xf32>
    %202 = arith.addf %201, %200 : vector<8x128xf32>
    %203 = arith.divf %201, %202 : vector<8x128xf32>
    %204 = vector.broadcast %176 : i32 to vector<8x1xi32>
    %205 = arith.cmpi sgt, %18, %204 : vector<8x1xi32>
    %206 = arith.extui %205 : vector<8x1xi1> to vector<8x1xi32>
    %207 = arith.sitofp %206 : vector<8x1xi32> to vector<8x1xf32>
    %208 = arith.mulf %195, %178 : vector<8x128xf32>
    %209 = arith.mulf %189, %197 : vector<8x128xf32>
    %210 = arith.addf %208, %209 : vector<8x128xf32>
    %211 = math.tanh %210 : vector<8x128xf32>
    %212 = arith.mulf %203, %211 : vector<8x128xf32>
    %213 = vector.shape_cast %205 : vector<8x1xi1> to vector<8x1xi1>
    %214 = vector.broadcast %213 : vector<8x1xi1> to vector<8x128xi1>
    %215 = arith.select %214, %210, %178 : vector<8x128xi1>, vector<8x128xf32>
    %c0_87 = arith.constant 0 : index
    %c0_88 = arith.constant 0 : index
    %216 = vector.load %arg10[%c0_87, %c0_88] : memref<8x128xf32, #tpu.memory_space<vmem>>, vector<8x128xf32>
    tpu.vector_store %arg10[%c0_87, %c0_88], %215 {strides = array<i32>} : memref<8x128xf32, #tpu.memory_space<vmem>>, vector<8x128xf32>,
    %217 = vector.shape_cast %205 : vector<8x1xi1> to vector<8x1xi1>
    %218 = vector.broadcast %217 : vector<8x1xi1> to vector<8x128xi1>
    %219 = arith.select %218, %212, %177 : vector<8x128xi1>, vector<8x128xf32>
    %c0_89 = arith.constant 0 : index
    %c0_90 = arith.constant 0 : index
    %220 = vector.load %arg9[%c0_89, %c0_90] : memref<8x128xf32, #tpu.memory_space<vmem>>, vector<8x128xf32>
    tpu.vector_store %arg9[%c0_89, %c0_90], %219 {strides = array<i32>} : memref<8x128xf32, #tpu.memory_space<vmem>>, vector<8x128xf32>,
    %221 = vector.broadcast %207 : vector<8x1xf32> to vector<8x128xf32>
    %222 = arith.mulf %212, %221 : vector<8x128xf32>
    %c0_91 = arith.constant 0 : index
    %223 = arith.index_cast %176 : i32 to index
    %c0_92 = arith.constant 0 : index
    %c0_93 = arith.constant 0 : index
    %224 = vector.load %arg6[%c0_91, %223, %c0_92, %c0_93] : memref<1x8x8x128xf32, #tpu.memory_space<vmem>>, vector<1x1x8x128xf32>
    %225 = vector.shape_cast %224 : vector<1x1x8x128xf32> to vector<8x128xf32>
    %226 = vector.shape_cast %222 : vector<8x128xf32> to vector<1x1x8x128xf32>
    tpu.vector_store %arg6[%c0_91, %223, %c0_92, %c0_93], %226 {strides = array<i32>} : memref<1x8x8x128xf32, #tpu.memory_space<vmem>>, vector<1x1x8x128xf32>,
    %c4_i32 = arith.constant 4 : i32
    %c7_i32_94 = arith.constant 7 : i32
    %227 = arith.subi %c7_i32_94, %c4_i32 : i32
    %228 = arith.select %0, %227, %c4_i32 : i32
    %c0_95 = arith.constant 0 : index
    %c0_96 = arith.constant 0 : index
    %229 = vector.load %arg9[%c0_95, %c0_96] : memref<8x128xf32, #tpu.memory_space<vmem>>, vector<8x128xf32>
    %c0_97 = arith.constant 0 : index
    %c0_98 = arith.constant 0 : index
    %230 = vector.load %arg10[%c0_97, %c0_98] : memref<8x128xf32, #tpu.memory_space<vmem>>, vector<8x128xf32>
    %231 = arith.index_cast %228 : i32 to index
    %c0_99 = arith.constant 0 : index
    %c0_100 = arith.constant 0 : index
    %232 = vector.load %arg8[%231, %c0_99, %c0_100] : memref<8x8x512xf32, #tpu.memory_space<vmem>>, vector<1x8x512xf32>
    %233 = vector.shape_cast %232 : vector<1x8x512xf32> to vector<8x512xf32>
    %cst_101 = arith.constant dense<0.000000e+00> : vector<8x512xf32>
    %234 = tpu.matmul %229, %17, %cst_101 {dimension_numbers = #tpu.dot_dimension_numbers<[1], [0], [0], [1], [0, 0, 1, 1], [], []>} : vector<8x128xf32>, vector<128x512xf32>, vector<8x512xf32> -> vector<8x512xf32>
    %235 = arith.addf %233, %234 : vector<8x512xf32>
    %236 = vector.extract_strided_slice %235 {offsets = [0, 0], sizes = [8, 128], strides = [1, 1]} : vector<8x512xf32> to vector<8x128xf32>
    %237 = arith.negf %236 : vector<8x128xf32>
    %238 = math.exp %237 : vector<8x128xf32>
    %cst_102 = arith.constant 1.000000e+00 : f32
    %239 = vector.broadcast %cst_102 : f32 to vector<8x128xf32>
    %240 = arith.addf %239, %238 : vector<8x128xf32>
    %241 = arith.divf %239, %240 : vector<8x128xf32>
    %242 = vector.extract_strided_slice %235 {offsets = [0, 128], sizes = [8, 128], strides = [1, 1]} : vector<8x512xf32> to vector<8x128xf32>
    %243 = arith.negf %242 : vector<8x128xf32>
    %244 = math.exp %243 : vector<8x128xf32>
    %cst_103 = arith.constant 1.000000e+00 : f32
    %245 = vector.broadcast %cst_103 : f32 to vector<8x128xf32>
    %246 = arith.addf %245, %244 : vector<8x128xf32>
    %247 = arith.divf %245, %246 : vector<8x128xf32>
    %248 = vector.extract_strided_slice %235 {offsets = [0, 256], sizes = [8, 128], strides = [1, 1]} : vector<8x512xf32> to vector<8x128xf32>
    %249 = math.tanh %248 : vector<8x128xf32>
    %250 = vector.extract_strided_slice %235 {offsets = [0, 384], sizes = [8, 128], strides = [1, 1]} : vector<8x512xf32> to vector<8x128xf32>
    %251 = arith.negf %250 : vector<8x128xf32>
    %252 = math.exp %251 : vector<8x128xf32>
    %cst_104 = arith.constant 1.000000e+00 : f32
    %253 = vector.broadcast %cst_104 : f32 to vector<8x128xf32>
    %254 = arith.addf %253, %252 : vector<8x128xf32>
    %255 = arith.divf %253, %254 : vector<8x128xf32>
    %256 = vector.broadcast %228 : i32 to vector<8x1xi32>
    %257 = arith.cmpi sgt, %18, %256 : vector<8x1xi32>
    %258 = arith.extui %257 : vector<8x1xi1> to vector<8x1xi32>
    %259 = arith.sitofp %258 : vector<8x1xi32> to vector<8x1xf32>
    %260 = arith.mulf %247, %230 : vector<8x128xf32>
    %261 = arith.mulf %241, %249 : vector<8x128xf32>
    %262 = arith.addf %260, %261 : vector<8x128xf32>
    %263 = math.tanh %262 : vector<8x128xf32>
    %264 = arith.mulf %255, %263 : vector<8x128xf32>
    %265 = vector.shape_cast %257 : vector<8x1xi1> to vector<8x1xi1>
    %266 = vector.broadcast %265 : vector<8x1xi1> to vector<8x128xi1>
    %267 = arith.select %266, %262, %230 : vector<8x128xi1>, vector<8x128xf32>
    %c0_105 = arith.constant 0 : index
    %c0_106 = arith.constant 0 : index
    %268 = vector.load %arg10[%c0_105, %c0_106] : memref<8x128xf32, #tpu.memory_space<vmem>>, vector<8x128xf32>
    tpu.vector_store %arg10[%c0_105, %c0_106], %267 {strides = array<i32>} : memref<8x128xf32, #tpu.memory_space<vmem>>, vector<8x128xf32>,
    %269 = vector.shape_cast %257 : vector<8x1xi1> to vector<8x1xi1>
    %270 = vector.broadcast %269 : vector<8x1xi1> to vector<8x128xi1>
    %271 = arith.select %270, %264, %229 : vector<8x128xi1>, vector<8x128xf32>
    %c0_107 = arith.constant 0 : index
    %c0_108 = arith.constant 0 : index
    %272 = vector.load %arg9[%c0_107, %c0_108] : memref<8x128xf32, #tpu.memory_space<vmem>>, vector<8x128xf32>
    tpu.vector_store %arg9[%c0_107, %c0_108], %271 {strides = array<i32>} : memref<8x128xf32, #tpu.memory_space<vmem>>, vector<8x128xf32>,
    %273 = vector.broadcast %259 : vector<8x1xf32> to vector<8x128xf32>
    %274 = arith.mulf %264, %273 : vector<8x128xf32>
    %c0_109 = arith.constant 0 : index
    %275 = arith.index_cast %228 : i32 to index
    %c0_110 = arith.constant 0 : index
    %c0_111 = arith.constant 0 : index
    %276 = vector.load %arg6[%c0_109, %275, %c0_110, %c0_111] : memref<1x8x8x128xf32, #tpu.memory_space<vmem>>, vector<1x1x8x128xf32>
    %277 = vector.shape_cast %276 : vector<1x1x8x128xf32> to vector<8x128xf32>
    %278 = vector.shape_cast %274 : vector<8x128xf32> to vector<1x1x8x128xf32>
    tpu.vector_store %arg6[%c0_109, %275, %c0_110, %c0_111], %278 {strides = array<i32>} : memref<1x8x8x128xf32, #tpu.memory_space<vmem>>, vector<1x1x8x128xf32>,
    %c5_i32 = arith.constant 5 : i32
    %c7_i32_112 = arith.constant 7 : i32
    %279 = arith.subi %c7_i32_112, %c5_i32 : i32
    %280 = arith.select %0, %279, %c5_i32 : i32
    %c0_113 = arith.constant 0 : index
    %c0_114 = arith.constant 0 : index
    %281 = vector.load %arg9[%c0_113, %c0_114] : memref<8x128xf32, #tpu.memory_space<vmem>>, vector<8x128xf32>
    %c0_115 = arith.constant 0 : index
    %c0_116 = arith.constant 0 : index
    %282 = vector.load %arg10[%c0_115, %c0_116] : memref<8x128xf32, #tpu.memory_space<vmem>>, vector<8x128xf32>
    %283 = arith.index_cast %280 : i32 to index
    %c0_117 = arith.constant 0 : index
    %c0_118 = arith.constant 0 : index
    %284 = vector.load %arg8[%283, %c0_117, %c0_118] : memref<8x8x512xf32, #tpu.memory_space<vmem>>, vector<1x8x512xf32>
    %285 = vector.shape_cast %284 : vector<1x8x512xf32> to vector<8x512xf32>
    %cst_119 = arith.constant dense<0.000000e+00> : vector<8x512xf32>
    %286 = tpu.matmul %281, %17, %cst_119 {dimension_numbers = #tpu.dot_dimension_numbers<[1], [0], [0], [1], [0, 0, 1, 1], [], []>} : vector<8x128xf32>, vector<128x512xf32>, vector<8x512xf32> -> vector<8x512xf32>
    %287 = arith.addf %285, %286 : vector<8x512xf32>
    %288 = vector.extract_strided_slice %287 {offsets = [0, 0], sizes = [8, 128], strides = [1, 1]} : vector<8x512xf32> to vector<8x128xf32>
    %289 = arith.negf %288 : vector<8x128xf32>
    %290 = math.exp %289 : vector<8x128xf32>
    %cst_120 = arith.constant 1.000000e+00 : f32
    %291 = vector.broadcast %cst_120 : f32 to vector<8x128xf32>
    %292 = arith.addf %291, %290 : vector<8x128xf32>
    %293 = arith.divf %291, %292 : vector<8x128xf32>
    %294 = vector.extract_strided_slice %287 {offsets = [0, 128], sizes = [8, 128], strides = [1, 1]} : vector<8x512xf32> to vector<8x128xf32>
    %295 = arith.negf %294 : vector<8x128xf32>
    %296 = math.exp %295 : vector<8x128xf32>
    %cst_121 = arith.constant 1.000000e+00 : f32
    %297 = vector.broadcast %cst_121 : f32 to vector<8x128xf32>
    %298 = arith.addf %297, %296 : vector<8x128xf32>
    %299 = arith.divf %297, %298 : vector<8x128xf32>
    %300 = vector.extract_strided_slice %287 {offsets = [0, 256], sizes = [8, 128], strides = [1, 1]} : vector<8x512xf32> to vector<8x128xf32>
    %301 = math.tanh %300 : vector<8x128xf32>
    %302 = vector.extract_strided_slice %287 {offsets = [0, 384], sizes = [8, 128], strides = [1, 1]} : vector<8x512xf32> to vector<8x128xf32>
    %303 = arith.negf %302 : vector<8x128xf32>
    %304 = math.exp %303 : vector<8x128xf32>
    %cst_122 = arith.constant 1.000000e+00 : f32
    %305 = vector.broadcast %cst_122 : f32 to vector<8x128xf32>
    %306 = arith.addf %305, %304 : vector<8x128xf32>
    %307 = arith.divf %305, %306 : vector<8x128xf32>
    %308 = vector.broadcast %280 : i32 to vector<8x1xi32>
    %309 = arith.cmpi sgt, %18, %308 : vector<8x1xi32>
    %310 = arith.extui %309 : vector<8x1xi1> to vector<8x1xi32>
    %311 = arith.sitofp %310 : vector<8x1xi32> to vector<8x1xf32>
    %312 = arith.mulf %299, %282 : vector<8x128xf32>
    %313 = arith.mulf %293, %301 : vector<8x128xf32>
    %314 = arith.addf %312, %313 : vector<8x128xf32>
    %315 = math.tanh %314 : vector<8x128xf32>
    %316 = arith.mulf %307, %315 : vector<8x128xf32>
    %317 = vector.shape_cast %309 : vector<8x1xi1> to vector<8x1xi1>
    %318 = vector.broadcast %317 : vector<8x1xi1> to vector<8x128xi1>
    %319 = arith.select %318, %314, %282 : vector<8x128xi1>, vector<8x128xf32>
    %c0_123 = arith.constant 0 : index
    %c0_124 = arith.constant 0 : index
    %320 = vector.load %arg10[%c0_123, %c0_124] : memref<8x128xf32, #tpu.memory_space<vmem>>, vector<8x128xf32>
    tpu.vector_store %arg10[%c0_123, %c0_124], %319 {strides = array<i32>} : memref<8x128xf32, #tpu.memory_space<vmem>>, vector<8x128xf32>,
    %321 = vector.shape_cast %309 : vector<8x1xi1> to vector<8x1xi1>
    %322 = vector.broadcast %321 : vector<8x1xi1> to vector<8x128xi1>
    %323 = arith.select %322, %316, %281 : vector<8x128xi1>, vector<8x128xf32>
    %c0_125 = arith.constant 0 : index
    %c0_126 = arith.constant 0 : index
    %324 = vector.load %arg9[%c0_125, %c0_126] : memref<8x128xf32, #tpu.memory_space<vmem>>, vector<8x128xf32>
    tpu.vector_store %arg9[%c0_125, %c0_126], %323 {strides = array<i32>} : memref<8x128xf32, #tpu.memory_space<vmem>>, vector<8x128xf32>,
    %325 = vector.broadcast %311 : vector<8x1xf32> to vector<8x128xf32>
    %326 = arith.mulf %316, %325 : vector<8x128xf32>
    %c0_127 = arith.constant 0 : index
    %327 = arith.index_cast %280 : i32 to index
    %c0_128 = arith.constant 0 : index
    %c0_129 = arith.constant 0 : index
    %328 = vector.load %arg6[%c0_127, %327, %c0_128, %c0_129] : memref<1x8x8x128xf32, #tpu.memory_space<vmem>>, vector<1x1x8x128xf32>
    %329 = vector.shape_cast %328 : vector<1x1x8x128xf32> to vector<8x128xf32>
    %330 = vector.shape_cast %326 : vector<8x128xf32> to vector<1x1x8x128xf32>
    tpu.vector_store %arg6[%c0_127, %327, %c0_128, %c0_129], %330 {strides = array<i32>} : memref<1x8x8x128xf32, #tpu.memory_space<vmem>>, vector<1x1x8x128xf32>,
    %c6_i32 = arith.constant 6 : i32
    %c7_i32_130 = arith.constant 7 : i32
    %331 = arith.subi %c7_i32_130, %c6_i32 : i32
    %332 = arith.select %0, %331, %c6_i32 : i32
    %c0_131 = arith.constant 0 : index
    %c0_132 = arith.constant 0 : index
    %333 = vector.load %arg9[%c0_131, %c0_132] : memref<8x128xf32, #tpu.memory_space<vmem>>, vector<8x128xf32>
    %c0_133 = arith.constant 0 : index
    %c0_134 = arith.constant 0 : index
    %334 = vector.load %arg10[%c0_133, %c0_134] : memref<8x128xf32, #tpu.memory_space<vmem>>, vector<8x128xf32>
    %335 = arith.index_cast %332 : i32 to index
    %c0_135 = arith.constant 0 : index
    %c0_136 = arith.constant 0 : index
    %336 = vector.load %arg8[%335, %c0_135, %c0_136] : memref<8x8x512xf32, #tpu.memory_space<vmem>>, vector<1x8x512xf32>
    %337 = vector.shape_cast %336 : vector<1x8x512xf32> to vector<8x512xf32>
    %cst_137 = arith.constant dense<0.000000e+00> : vector<8x512xf32>
    %338 = tpu.matmul %333, %17, %cst_137 {dimension_numbers = #tpu.dot_dimension_numbers<[1], [0], [0], [1], [0, 0, 1, 1], [], []>} : vector<8x128xf32>, vector<128x512xf32>, vector<8x512xf32> -> vector<8x512xf32>
    %339 = arith.addf %337, %338 : vector<8x512xf32>
    %340 = vector.extract_strided_slice %339 {offsets = [0, 0], sizes = [8, 128], strides = [1, 1]} : vector<8x512xf32> to vector<8x128xf32>
    %341 = arith.negf %340 : vector<8x128xf32>
    %342 = math.exp %341 : vector<8x128xf32>
    %cst_138 = arith.constant 1.000000e+00 : f32
    %343 = vector.broadcast %cst_138 : f32 to vector<8x128xf32>
    %344 = arith.addf %343, %342 : vector<8x128xf32>
    %345 = arith.divf %343, %344 : vector<8x128xf32>
    %346 = vector.extract_strided_slice %339 {offsets = [0, 128], sizes = [8, 128], strides = [1, 1]} : vector<8x512xf32> to vector<8x128xf32>
    %347 = arith.negf %346 : vector<8x128xf32>
    %348 = math.exp %347 : vector<8x128xf32>
    %cst_139 = arith.constant 1.000000e+00 : f32
    %349 = vector.broadcast %cst_139 : f32 to vector<8x128xf32>
    %350 = arith.addf %349, %348 : vector<8x128xf32>
    %351 = arith.divf %349, %350 : vector<8x128xf32>
    %352 = vector.extract_strided_slice %339 {offsets = [0, 256], sizes = [8, 128], strides = [1, 1]} : vector<8x512xf32> to vector<8x128xf32>
    %353 = math.tanh %352 : vector<8x128xf32>
    %354 = vector.extract_strided_slice %339 {offsets = [0, 384], sizes = [8, 128], strides = [1, 1]} : vector<8x512xf32> to vector<8x128xf32>
    %355 = arith.negf %354 : vector<8x128xf32>
    %356 = math.exp %355 : vector<8x128xf32>
    %cst_140 = arith.constant 1.000000e+00 : f32
    %357 = vector.broadcast %cst_140 : f32 to vector<8x128xf32>
    %358 = arith.addf %357, %356 : vector<8x128xf32>
    %359 = arith.divf %357, %358 : vector<8x128xf32>
    %360 = vector.broadcast %332 : i32 to vector<8x1xi32>
    %361 = arith.cmpi sgt, %18, %360 : vector<8x1xi32>
    %362 = arith.extui %361 : vector<8x1xi1> to vector<8x1xi32>
    %363 = arith.sitofp %362 : vector<8x1xi32> to vector<8x1xf32>
    %364 = arith.mulf %351, %334 : vector<8x128xf32>
    %365 = arith.mulf %345, %353 : vector<8x128xf32>
    %366 = arith.addf %364, %365 : vector<8x128xf32>
    %367 = math.tanh %366 : vector<8x128xf32>
    %368 = arith.mulf %359, %367 : vector<8x128xf32>
    %369 = vector.shape_cast %361 : vector<8x1xi1> to vector<8x1xi1>
    %370 = vector.broadcast %369 : vector<8x1xi1> to vector<8x128xi1>
    %371 = arith.select %370, %366, %334 : vector<8x128xi1>, vector<8x128xf32>
    %c0_141 = arith.constant 0 : index
    %c0_142 = arith.constant 0 : index
    %372 = vector.load %arg10[%c0_141, %c0_142] : memref<8x128xf32, #tpu.memory_space<vmem>>, vector<8x128xf32>
    tpu.vector_store %arg10[%c0_141, %c0_142], %371 {strides = array<i32>} : memref<8x128xf32, #tpu.memory_space<vmem>>, vector<8x128xf32>,
    %373 = vector.shape_cast %361 : vector<8x1xi1> to vector<8x1xi1>
    %374 = vector.broadcast %373 : vector<8x1xi1> to vector<8x128xi1>
    %375 = arith.select %374, %368, %333 : vector<8x128xi1>, vector<8x128xf32>
    %c0_143 = arith.constant 0 : index
    %c0_144 = arith.constant 0 : index
    %376 = vector.load %arg9[%c0_143, %c0_144] : memref<8x128xf32, #tpu.memory_space<vmem>>, vector<8x128xf32>
    tpu.vector_store %arg9[%c0_143, %c0_144], %375 {strides = array<i32>} : memref<8x128xf32, #tpu.memory_space<vmem>>, vector<8x128xf32>,
    %377 = vector.broadcast %363 : vector<8x1xf32> to vector<8x128xf32>
    %378 = arith.mulf %368, %377 : vector<8x128xf32>
    %c0_145 = arith.constant 0 : index
    %379 = arith.index_cast %332 : i32 to index
    %c0_146 = arith.constant 0 : index
    %c0_147 = arith.constant 0 : index
    %380 = vector.load %arg6[%c0_145, %379, %c0_146, %c0_147] : memref<1x8x8x128xf32, #tpu.memory_space<vmem>>, vector<1x1x8x128xf32>
    %381 = vector.shape_cast %380 : vector<1x1x8x128xf32> to vector<8x128xf32>
    %382 = vector.shape_cast %378 : vector<8x128xf32> to vector<1x1x8x128xf32>
    tpu.vector_store %arg6[%c0_145, %379, %c0_146, %c0_147], %382 {strides = array<i32>} : memref<1x8x8x128xf32, #tpu.memory_space<vmem>>, vector<1x1x8x128xf32>,
    %c7_i32_148 = arith.constant 7 : i32
    %c7_i32_149 = arith.constant 7 : i32
    %383 = arith.subi %c7_i32_149, %c7_i32_148 : i32
    %384 = arith.select %0, %383, %c7_i32_148 : i32
    %c0_150 = arith.constant 0 : index
    %c0_151 = arith.constant 0 : index
    %385 = vector.load %arg9[%c0_150, %c0_151] : memref<8x128xf32, #tpu.memory_space<vmem>>, vector<8x128xf32>
    %c0_152 = arith.constant 0 : index
    %c0_153 = arith.constant 0 : index
    %386 = vector.load %arg10[%c0_152, %c0_153] : memref<8x128xf32, #tpu.memory_space<vmem>>, vector<8x128xf32>
    %387 = arith.index_cast %384 : i32 to index
    %c0_154 = arith.constant 0 : index
    %c0_155 = arith.constant 0 : index
    %388 = vector.load %arg8[%387, %c0_154, %c0_155] : memref<8x8x512xf32, #tpu.memory_space<vmem>>, vector<1x8x512xf32>
    %389 = vector.shape_cast %388 : vector<1x8x512xf32> to vector<8x512xf32>
    %cst_156 = arith.constant dense<0.000000e+00> : vector<8x512xf32>
    %390 = tpu.matmul %385, %17, %cst_156 {dimension_numbers = #tpu.dot_dimension_numbers<[1], [0], [0], [1], [0, 0, 1, 1], [], []>} : vector<8x128xf32>, vector<128x512xf32>, vector<8x512xf32> -> vector<8x512xf32>
    %391 = arith.addf %389, %390 : vector<8x512xf32>
    %392 = vector.extract_strided_slice %391 {offsets = [0, 0], sizes = [8, 128], strides = [1, 1]} : vector<8x512xf32> to vector<8x128xf32>
    %393 = arith.negf %392 : vector<8x128xf32>
    %394 = math.exp %393 : vector<8x128xf32>
    %cst_157 = arith.constant 1.000000e+00 : f32
    %395 = vector.broadcast %cst_157 : f32 to vector<8x128xf32>
    %396 = arith.addf %395, %394 : vector<8x128xf32>
    %397 = arith.divf %395, %396 : vector<8x128xf32>
    %398 = vector.extract_strided_slice %391 {offsets = [0, 128], sizes = [8, 128], strides = [1, 1]} : vector<8x512xf32> to vector<8x128xf32>
    %399 = arith.negf %398 : vector<8x128xf32>
    %400 = math.exp %399 : vector<8x128xf32>
    %cst_158 = arith.constant 1.000000e+00 : f32
    %401 = vector.broadcast %cst_158 : f32 to vector<8x128xf32>
    %402 = arith.addf %401, %400 : vector<8x128xf32>
    %403 = arith.divf %401, %402 : vector<8x128xf32>
    %404 = vector.extract_strided_slice %391 {offsets = [0, 256], sizes = [8, 128], strides = [1, 1]} : vector<8x512xf32> to vector<8x128xf32>
    %405 = math.tanh %404 : vector<8x128xf32>
    %406 = vector.extract_strided_slice %391 {offsets = [0, 384], sizes = [8, 128], strides = [1, 1]} : vector<8x512xf32> to vector<8x128xf32>
    %407 = arith.negf %406 : vector<8x128xf32>
    %408 = math.exp %407 : vector<8x128xf32>
    %cst_159 = arith.constant 1.000000e+00 : f32
    %409 = vector.broadcast %cst_159 : f32 to vector<8x128xf32>
    %410 = arith.addf %409, %408 : vector<8x128xf32>
    %411 = arith.divf %409, %410 : vector<8x128xf32>
    %412 = vector.broadcast %384 : i32 to vector<8x1xi32>
    %413 = arith.cmpi sgt, %18, %412 : vector<8x1xi32>
    %414 = arith.extui %413 : vector<8x1xi1> to vector<8x1xi32>
    %415 = arith.sitofp %414 : vector<8x1xi32> to vector<8x1xf32>
    %416 = arith.mulf %403, %386 : vector<8x128xf32>
    %417 = arith.mulf %397, %405 : vector<8x128xf32>
    %418 = arith.addf %416, %417 : vector<8x128xf32>
    %419 = math.tanh %418 : vector<8x128xf32>
    %420 = arith.mulf %411, %419 : vector<8x128xf32>
    %421 = vector.shape_cast %413 : vector<8x1xi1> to vector<8x1xi1>
    %422 = vector.broadcast %421 : vector<8x1xi1> to vector<8x128xi1>
    %423 = arith.select %422, %418, %386 : vector<8x128xi1>, vector<8x128xf32>
    %c0_160 = arith.constant 0 : index
    %c0_161 = arith.constant 0 : index
    %424 = vector.load %arg10[%c0_160, %c0_161] : memref<8x128xf32, #tpu.memory_space<vmem>>, vector<8x128xf32>
    tpu.vector_store %arg10[%c0_160, %c0_161], %423 {strides = array<i32>} : memref<8x128xf32, #tpu.memory_space<vmem>>, vector<8x128xf32>,
    %425 = vector.shape_cast %413 : vector<8x1xi1> to vector<8x1xi1>
    %426 = vector.broadcast %425 : vector<8x1xi1> to vector<8x128xi1>
    %427 = arith.select %426, %420, %385 : vector<8x128xi1>, vector<8x128xf32>
    %c0_162 = arith.constant 0 : index
    %c0_163 = arith.constant 0 : index
    %428 = vector.load %arg9[%c0_162, %c0_163] : memref<8x128xf32, #tpu.memory_space<vmem>>, vector<8x128xf32>
    tpu.vector_store %arg9[%c0_162, %c0_163], %427 {strides = array<i32>} : memref<8x128xf32, #tpu.memory_space<vmem>>, vector<8x128xf32>,
    %429 = vector.broadcast %415 : vector<8x1xf32> to vector<8x128xf32>
    %430 = arith.mulf %420, %429 : vector<8x128xf32>
    %c0_164 = arith.constant 0 : index
    %431 = arith.index_cast %384 : i32 to index
    %c0_165 = arith.constant 0 : index
    %c0_166 = arith.constant 0 : index
    %432 = vector.load %arg6[%c0_164, %431, %c0_165, %c0_166] : memref<1x8x8x128xf32, #tpu.memory_space<vmem>>, vector<1x1x8x128xf32>
    %433 = vector.shape_cast %432 : vector<1x1x8x128xf32> to vector<8x128xf32>
    %434 = vector.shape_cast %430 : vector<8x128xf32> to vector<1x1x8x128xf32>
    tpu.vector_store %arg6[%c0_164, %431, %c0_165, %c0_166], %434 {strides = array<i32>} : memref<1x8x8x128xf32, #tpu.memory_space<vmem>>, vector<1x1x8x128xf32>,
    %c8_i32 = arith.constant 8 : i32
    %c0_167 = arith.constant 0 : index
    %c0_168 = arith.constant 0 : index
    %435 = vector.load %arg9[%c0_167, %c0_168] : memref<8x128xf32, #tpu.memory_space<vmem>>, vector<8x128xf32>
    %c0_169 = arith.constant 0 : index
    %c0_170 = arith.constant 0 : index
    %c0_171 = arith.constant 0 : index
    %436 = vector.load %arg7[%c0_169, %c0_170, %c0_171] : memref<1x8x128xf32, #tpu.memory_space<vmem>>, vector<1x8x128xf32>
    %437 = vector.shape_cast %436 : vector<1x8x128xf32> to vector<8x128xf32>
    %438 = vector.shape_cast %435 : vector<8x128xf32> to vector<1x8x128xf32>
    tpu.vector_store %arg7[%c0_169, %c0_170, %c0_171], %438 {strides = array<i32>} : memref<1x8x128xf32, #tpu.memory_space<vmem>>, vector<1x8x128xf32>,
    return
  }
  func.func @transform_0(%arg0: i32) -> (i32, i32, i32) {
    %c0_i32 = arith.constant 0 : i32
    %c0_i32_0 = arith.constant 0 : i32
    %c0_i32_1 = arith.constant 0 : i32
    %c0_i32_2 = arith.constant 0 : i32
    return %c0_i32, %c0_i32_0, %c0_i32_1 : i32, i32, i32
  }
  func.func @transform_1(%arg0: i32) -> (i32, i32, i32) {
    %c0_i32 = arith.constant 0 : i32
    %c0_i32_0 = arith.constant 0 : i32
    %c0_i32_1 = arith.constant 0 : i32
    return %arg0, %c0_i32, %c0_i32_0 : i32, i32, i32
  }
  func.func @transform_2(%arg0: i32) -> (i32, i32, i32) {
    %c0_i32 = arith.constant 0 : i32
    %c0_i32_0 = arith.constant 0 : i32
    %c0_i32_1 = arith.constant 0 : i32
    return %arg0, %c0_i32, %c0_i32_0 : i32, i32, i32
  }
  func.func @transform_3(%arg0: i32) -> (i32, i32, i32) {
    %c0_i32 = arith.constant 0 : i32
    %c0_i32_0 = arith.constant 0 : i32
    %c0_i32_1 = arith.constant 0 : i32
    return %arg0, %c0_i32, %c0_i32_0 : i32, i32, i32
  }
  func.func @transform_4(%arg0: i32) -> (i32, i32) {
    %c0_i32 = arith.constant 0 : i32
    %c0_i32_0 = arith.constant 0 : i32
    %c0_i32_1 = arith.constant 0 : i32
    return %c0_i32, %c0_i32_0 : i32, i32
  }
  func.func @transform_5(%arg0: i32) -> (i32, i32, i32, i32) {
    %c0_i32 = arith.constant 0 : i32
    %c0_i32_0 = arith.constant 0 : i32
    %c0_i32_1 = arith.constant 0 : i32
    %c0_i32_2 = arith.constant 0 : i32
    return %arg0, %c0_i32, %c0_i32_0, %c0_i32_1 : i32, i32, i32, i32
  }
  func.func @transform_6(%arg0: i32) -> (i32, i32, i32) {
    %c0_i32 = arith.constant 0 : i32
    %c0_i32_0 = arith.constant 0 : i32
    %c0_i32_1 = arith.constant 0 : i32
    return %arg0, %c0_i32, %c0_i32_0 : i32, i32, i32
  }
}

</mosaic_0001>

<bundles_post_ra>
// kernel: forward.1
= control target key start
LH: loop header
LB: loop body
LE: loop exit
PB: predicated region body
PF: predicated region fallthrough
CT: control target
= control target key end

     0   :  { %12 = vsyncpa [#allocation6], 0  ;;  %s4511_s0 = inlined_call_operand.vmem [shape: f32[8,8,128], index: 0, kind: input, shape index: {}]   ;;  %s4512_s1 = inlined_call_operand.hbm [shape: f32[2,128,512], index: 1, kind: input, shape index: {}]   ;;  %s4513_s2 = inlined_call_operand.hbm [shape: f32[2,128,512], index: 2, kind: input, shape index: {}]   ;;  %s4514_s3 = inlined_call_operand.vmem [shape: f32[2,1,512], index: 3, kind: input, shape index: {}]   ;;  %s4515_s4 = inlined_call_operand.vmem [shape: s32[8,1], index: 4, kind: input, shape index: {}]   ;;  %s4516_s5 = inlined_call_operand.vmem [shape: f32[2,8,8,128], index: 5, kind: output, shape index: {0}]   ;;  %s4517_s6 = inlined_call_operand.vmem [shape: f32[2,8,128], index: 6, kind: output, shape index: {1}]  }
   0x1   :  { %14 = vsyncpa [#allocation6 + $0x1], 0 }
   0x2   :  { %15 = vsyncpa [#allocation8], 0 }
   0x3   :  { %17 = vsyncpa [#allocation8 + $0x1], 0  ;;  %s3537_s21 = smov 0   ;;  %s3539_s22 = smov 0  }
   0x4   :  { %s3541_s23 = smov 0   ;;  %s3543_s24 = smov 0  }
   0x5 LB: > { %s3556_s25 = sadd.s32 4294967295, %s3494_s24   ;;  %s3559_s26 = sadd.s32 1, %s3494_s24   ;;  %s3494_s24 = sphi %s3543_s24, %s4543_s24   ;;  %s3490_s23 = sphi %s3541_s23, %s4542_s23   ;;  %s3486_s22 = sphi %s3539_s22, %s4541_s22   ;;  %s3482_s21 = sphi %s3537_s21, %s4540_s21  }
   0x6   : > { %s48_s27 = ssub.s32 %s3494_s24, %s3559_s26  ;;  %s51_s28 = sadd.s32 1, %s3490_s23 }
   0x7   : > { %p49_p0 = scmp.eq.s32.totalorder %s48_s27, 0  ;;  %p58_p1 = scmp.ne.s32.totalorder %s3490_s23, %s3486_s22 }
   0x8   : > { %p59_p2 = scmp.eq.s32.totalorder %s3494_s24, 0  ;;  %p64_p3 = scmp.ne.s32.totalorder %s3486_s22, %s3482_s21 }
   0x9   : > { %s3569_s29 = scalar_select %p49_p0, %s3490_s23, %s51_s28  }
   0xa   : > { %p60_p4 = por %p59_p2, %p58_p1  ;;  %p65_p5 = scmp.eq.s32.totalorder %s3556_s25, 0 }
   0xb   : > { %p3209_p6 = scmp.lt.s32.totalorder %s3494_s24, 2  ;;  %s3578_s7 = sand.u32 1, %s3490_s23  }
   0xc   : > { %p3573_p7 = por %p65_p5, %p64_p3  ;;  %s2538_s8 = sshll.u32 %s3578_s7, 9 }
   0xd   : > { %s2609_s9 = sshll.u32 %s3494_s24, 13  ;;  %s223_s13 = scalar_lea.vmem [#allocation5], %s2538_s8 }
   0xe   : > { %s4519_s30 = scalar_select %p3573_p7, 1, 0 }
   0xf   : > { %s3587_s12 = scalar_lea.hbm %s4512_s1, %s2609_s9  ;;  %s230_s14 = sshll.u32 %s223_s13, 4  ;;  %s3591_s14 = int_to_ptr.vmem [resolvable:$true] %s230_s14 }
  0x10   : > { %p3593_p8 = pnand %p3209_p6, %p60_p4  ;;  %s220_s16 = scalar_lea.sflag [#allocation6], %s3578_s7 }
  0x11   : > { %s3396_s17 = scalar_lea.hbm %s3587_s12, 8192  ;;  %s3401_s20 = scalar_lea.hbm %s4512_s1, 16384 }
  0x12   : > { %p3397_p10 = scmp.ne.s32.totalorder %s3587_s12, %s3396_s17  ;;  %p3398_p11 = pneg %p3593_p8 }
  0x13   : > { %p3402_p0 = scmp.lt.u32.totalorder %s3587_s12, %s4512_s1  ;;  %p3403_p1 = scmp.lt.u32.totalorder %s3401_s20, %s3396_s17 }
  0x14   : > { %p3399_p12 = pnand %p3398_p11, %p3397_p10  ;;  %p3405_p3 = scmp.lt.u32.totalorder %s3396_s17, %s3587_s12 }
  0x15   : > { %p3404_p2 = por %p3403_p1, %p3402_p0 }
  0x16   : > { %p3400_p13 = pneg %p3399_p12 }
  0x17   : > { %p3406_p4 = por %p3405_p3, %p3404_p2 }
  0x19   : > { %p3407_p5 = pnand %p3406_p4, %p3400_p13 }
  0x1b   : > { %3410 = shalt.err (!%p3407_p5)
}
  0x1c   : > { %s3411_s28 = scalar_lea.vmem %s3591_s14, 8192  ;;  %s3496_s10 = smov [#allocation5]  }
  0x1d   : > { %p3412_p6 = scmp.ne.s32.totalorder %s3591_s14, %s3411_s28  ;;  %s3416_s11 = sshll.u32 %s3496_s10, 4  ;;  %s3417_s11 = int_to_ptr.vmem [resolvable:$false] %s3416_s11 }
  0x1e   : > { %s3418_s13 = scalar_lea.vmem %s3417_s11, 16384  ;;  %p3419_p9 = scmp.lt.s32.totalorder %s3591_s14, %s3417_s11 }
  0x1f   : > { %p3414_p10 = pnand %p3412_p6, %p3398_p11  ;;  %p3420_p0 = scmp.lt.s32.totalorder %s3418_s13, %s3411_s28 }
  0x21   : > { %p3415_p12 = pneg %p3414_p10  ;;  %p3421_p1 = por %p3420_p0, %p3419_p9 }
  0x23   : > { %p3422_p2 = pnand %p3421_p1, %p3415_p12 }
  0x25   : > { %3425 = shalt.err (!%p3422_p2)
}
  0x26   : > { %s3497_s17 = smov 512   ;;  %s3498_s18 = smov 32  }
  0x27   : > { %3205 = dma.hbm_to_vmem [thread:$0]  (!%p3593_p8), %s3587_s12, 8192, %s3591_s14, %s220_s16, %s3497_s17, %s3497_s17, %s3498_s18  }
  0x28   : > { %p266_p9 = scmp.lt.s32.totalorder %s3494_s24, 3  ;;  %s3635_s21 = scalar_lea.hbm %s4513_s2, %s2609_s9 }
  0x29   : > { %p4521_p13 = scmp.ge.s32.totalorder %s3494_s24, 1  ;;  %s244_s28 = scalar_lea.vmem [#allocation7], %s2538_s8 }
  0x2a   : > { %s251_s10 = sshll.u32 %s244_s28, 4  ;;  %s241_s12 = scalar_lea.sflag [#allocation8], %s3578_s7  ;;  %s3645_s10 = int_to_ptr.vmem [resolvable:$true] %s251_s10 }
  0x2b   : > { %p3639_p3 = pnand %p4521_p13, %p266_p9  ;;  %s3426_s14 = scalar_lea.hbm %s3635_s21, 8192 }
  0x2c   : > { %p3427_p4 = scmp.ne.s32.totalorder %s3635_s21, %s3426_s14  ;;  %s3431_s16 = scalar_lea.hbm %s4513_s2, 16384 }
  0x2d   : > { %p3432_p10 = scmp.lt.u32.totalorder %s3635_s21, %s4513_s2  ;;  %p3433_p12 = scmp.lt.u32.totalorder %s3431_s16, %s3426_s14 }
  0x2e   : > { %p3429_p5 = pnand %p3427_p4, %p3398_p11  ;;  %p3435_p1 = scmp.lt.u32.totalorder %s3426_s14, %s3635_s21 }
  0x2f   : > { %p3434_p0 = por %p3433_p12, %p3432_p10 }
  0x30   : > { %p3430_p6 = pneg %p3429_p5 }
  0x31   : > { %p3436_p2 = por %p3435_p1, %p3434_p0 }
  0x33   : > { %p3437_p9 = pnand %p3436_p2, %p3430_p6 }
  0x35   : > { %3440 = shalt.err (!%p3437_p9)
}
  0x36   : > { %s3441_s8 = scalar_lea.vmem %s3645_s10, 8192  ;;  %s3499_s19 = smov [#allocation7]  }
  0x37   : > { %p3442_p13 = scmp.ne.s32.totalorder %s3645_s10, %s3441_s8  ;;  %s3446_s20 = sshll.u32 %s3499_s19, 4  ;;  %s3447_s20 = int_to_ptr.vmem [resolvable:$false] %s3446_s20 }
  0x38   : > { %s3448_s28 = scalar_lea.vmem %s3447_s20, 16384  ;;  %p3449_p7 = scmp.lt.s32.totalorder %s3645_s10, %s3447_s20 }
  0x39   : > { %p3444_p4 = pnand %p3442_p13, %p3398_p11  ;;  %p3450_p10 = scmp.lt.s32.totalorder %s3448_s28, %s3441_s8 }
  0x3b   : > { %p3445_p5 = pneg %p3444_p4  ;;  %p3451_p12 = por %p3450_p10, %p3449_p7 }
  0x3d   : > { %p3452_p0 = pnand %p3451_p12, %p3445_p5 }
  0x3f   : > { %3455 = shalt.err (!%p3452_p0)
}
  0x40   : > { %3208 = dma.hbm_to_vmem [thread:$0]  (!%p3593_p8), %s3635_s21, 8192, %s3645_s10, %s241_s12, %s3497_s17, %s3497_s17, %s3498_s18  }
  0x41   : > { %270 = sbr.rel (%p3639_p3) target bundleno = 2224 (0x8b0), region = 40  ;;  %s272_s14 = sand.u32 (!%p3639_p3), 1, %s3486_s22  }
  0x42   : > { %s2545_s24 = sshll.u32 (!%p3639_p3), %s272_s14, 9  ;;  %s273_s9 = scalar_lea.sflag (!%p3639_p3), [#allocation6], %s272_s14 }
  0x43   : > { %s3679_s16 = scalar_lea.vmem (!%p3639_p3), [#allocation5], %s2545_s24  ;;  %p4523_p7 = scmp.ne.s32.totalorder (!%p3639_p3), %s4519_s30, 0 }
  0x48   : > { %3473 = dma.done.wait (%p4523_p7), %s273_s9, 8192  }
  0x49   : > { %3475 = vsyncadd (%p4523_p7), %s273_s9, 4294959104  ;;  %s282_s7 = scalar_lea.sflag [#allocation8], %s272_s14  ;;  %s3685_s15 = scalar_lea.vmem [#allocation7], %s2545_s24 }
  0x4a   : > { %3477 = dma.done.wait (%p4523_p7), %s282_s7, 8192  }
  0x4b   : > { %3479 = vsyncadd (%p4523_p7), %s282_s7, 4294959104  ;;  %v3500_v0 = vmov 0.0   ;;  %v3501_v1 = vmov 0   ;;  %v350_v2 = vld [vmem:[%s3679_s16 + $0x8] sm:$0xff]  ;;  %v352_v4 = vld [vmem:[%s3679_s16 + $0x18] sm:$0xff]  ;;  %p340_p8 = scmp.eq.s32.totalorder %s3556_s25, 1 }
  0x4c   : > { %499 = vmatprep.mubr.f32.mxu0 %v3500_v0  ;;  %612 = vmatprep.mubr.f32.mxu1 %v3500_v0  ;;  %v354_v3 = vld [vmem:[%s3679_s16 + $0x28] sm:$0xff]  ;;  %v356_v6 = vld [vmem:[%s3679_s16 + $0x38] sm:$0xff]  ;;  %v349_v7 = vld [vmem:[%s3679_s16] sm:$0xff]  ;;  %p327_p11 = scmp.lt.s32.totalorder %s3556_s25, 1 }
  0x4d   : > { %3246 = vset.pattern.permute.xlu0 %v3501_v1  ;;  %3247 = vset.pattern.permute.xlu1 %v3501_v1  ;;  %v2622_v5 = vpack.c.bf16 %v354_v3, %v350_v2  ;;  %v353_v8 = vld [vmem:[%s3679_s16 + $0x20] sm:$0xff]  ;;  %v2654_v9 = vpack.c.bf16 %v356_v6, %v352_v4  ;;  %v351_v11 = vld [vmem:[%s3679_s16 + $0x10] sm:$0xff]  ;;  %v358_v13 = vld [vmem:[%s3679_s16 + $0x48] sm:$0xff]  ;;  %s3907_s28 = scalar_select %p340_p8, 7, 0 }
  0x4e   : > { %v2624_v10 = vpack.c.bf16 %v353_v8, %v349_v7  ;;  %v355_v12 = vld [vmem:[%s3679_s16 + $0x30] sm:$0xff]  ;;  %v362_v15 = vld [vmem:[%s3679_s16 + $0x68] sm:$0xff]  ;;  %v360_v16 = vld [vmem:[%s3679_s16 + $0x58] sm:$0xff]  ;;  %s3920_s14 = scalar_select %p340_p8, 5, 2 }
  0x4f   : > { %2623 = vmatprep.subr.bf16.mxu0 %v2622_v5  ;;  %v2656_v14 = vpack.c.bf16 %v355_v12, %v351_v11  ;;  %v364_v17 = vld [vmem:[%s3679_s16 + $0x78] sm:$0xff]  ;;  %2655 = vmatprep.subr.bf16.mxu1 %v2654_v9  ;;  %v2626_v18 = vpack.c.bf16 %v362_v15, %v358_v13  ;;  %v357_v20 = vld [vmem:[%s3679_s16 + $0x40] sm:$0xff]  ;;  %v359_v22 = vld [vmem:[%s3679_s16 + $0x50] sm:$0xff]  ;;  %s3946_s30 = scalar_select %p340_p8, 6, 1 }
  0x50   : > { %2625 = vmatpush1.bf16.msra.mxu0 %v2624_v10  ;;  %v2658_v19 = vpack.c.bf16 %v364_v17, %v360_v16  ;;  %v361_v21 = vld [vmem:[%s3679_s16 + $0x60] sm:$0xff]  ;;  %v363_v24 = vld [vmem:[%s3679_s16 + $0x70] sm:$0xff]  ;;  %v366_v25 = vld [vmem:[%s3679_s16 + $0x88] sm:$0xff]  ;;  %s3959_s17 = scalar_select %p340_p8, 4, 3 }
  0x51   : > { %2657 = vmatpush1.bf16.msra.mxu1 %v2656_v14  ;;  %v2628_v23 = vpack.c.bf16 %v361_v21, %v357_v20  ;;  %v370_v26 = vld [vmem:[%s3679_s16 + $0xa8] sm:$0xff]  ;;  %2627 = vmatprep.subr.bf16.mxu0 %v2626_v18  ;;  %v2660_v27 = vpack.c.bf16 %v363_v24, %v359_v22  ;;  %v368_v29 = vld [vmem:[%s3679_s16 + $0x98] sm:$0xff]  ;;  %v365_v31 = vld [vmem:[%s3679_s16 + $0x80] sm:$0xff]  ;;  %s3996_s27 = scalar_select %p340_p8, 2, 5 }
  0x52   : > { %2659 = vmatprep.subr.bf16.mxu1 %v2658_v19  ;;  %v2630_v28 = vpack.c.bf16 %v370_v26, %v366_v25  ;;  %v372_v30 = vld [vmem:[%s3679_s16 + $0xb8] sm:$0xff]  ;;  %v369_v33 = vld [vmem:[%s3679_s16 + $0xa0] sm:$0xff]  ;;  %v367_v34 = vld [vmem:[%s3679_s16 + $0x90] sm:$0xff]  ;;  %s4021_s10 = scalar_select %p340_p8, 1, 6 }
  0x53   : > { %v2662_v32 = vpack.c.bf16 %v372_v30, %v368_v29  ;;  %v371_v35 = vld [vmem:[%s3679_s16 + $0xb0] sm:$0xff]  ;;  %v2632_v36 = vpack.c.bf16 %v369_v33, %v365_v31  ;;  %v374_v37 = vld [vmem:[%s3679_s16 + $0xc8] sm:$0xff]  ;;  %v376_v39 = vld [vmem:[%s3679_s16 + $0xd8] sm:$0xff]  ;;  %s4048_s12 = scalar_select %p340_p8, 0, 7 }
  0x54   : > { %2629 = vmatpush1.bf16.msra.mxu0 %v2628_v23  ;;  %v378_v38 = vld [vmem:[%s3679_s16 + $0xe8] sm:$0xff]  ;;  %v2664_v40 = vpack.c.bf16 %v371_v35, %v367_v34  ;;  %v380_v42 = vld [vmem:[%s3679_s16 + $0xf8] sm:$0xff]  ;;  %v373_v43 = vld [vmem:[%s3679_s16 + $0xc0] sm:$0xff]  ;;  %s4545_s25 = smov (!%p327_p11, %s3556_s25), 1  ;;  %s2612_s20 = sshll.u32 %s3907_s28, 5 }
  0x55   : > { %2661 = vmatpush1.bf16.msra.mxu1 %v2660_v27  ;;  %2631 = vmatprep.subr.bf16.mxu0 %v2630_v28  ;;  %v2634_v41 = vpack.c.bf16 %v378_v38, %v374_v37  ;;  %v377_v44 = vld [vmem:[%s3679_s16 + $0xe0] sm:$0xff]  ;;  %v2666_v45 = vpack.c.bf16 %v380_v42, %v376_v39  ;;  %v375_v46 = vld [vmem:[%s3679_s16 + $0xd0] sm:$0xff]  ;;  %v382_v48 = vld [vmem:[%s3679_s16 + $0x108] sm:$0xff]  ;;  %s2547_s11 = sshll.u32 %s4545_s25, 2  ;;  %s765_s24 = scalar_lea.vmem [#allocation2], %s2612_s20 }
  0x56   : > { %2663 = vmatprep.subr.bf16.mxu1 %v2662_v32  ;;  %v379_v47 = vld [vmem:[%s3679_s16 + $0xf0] sm:$0xff]  ;;  %v386_v49 = vld [vmem:[%s3679_s16 + $0x128] sm:$0xff]  ;;  %v384_v50 = vld [vmem:[%s3679_s16 + $0x118] sm:$0xff]  ;;  %v2636_v52 = vpack.c.bf16 %v377_v44, %v373_v43  ;;  %s330_s19 = scalar_lea.vmem %s4514_s3, %s2547_s11  ;;  %s2611_s9 = sshll.u32 %s4545_s25, 6 }
  0x57   : > { %v388_v51 = vld [vmem:[%s3679_s16 + $0x138] sm:$0xff]  ;;  %v2668_v53 = vpack.c.bf16 %v379_v47, %v375_v46  ;;  %v2638_v54 = vpack.c.bf16 %v386_v49, %v382_v48  ;;  %v381_v55 = vld [vmem:[%s3679_s16 + $0x100] sm:$0xff]  ;;  %v383_v57 = vld [vmem:[%s3679_s16 + $0x110] sm:$0xff]  ;;  %s4186_s18 = scalar_lea.vmem %s4516_s5, %s2611_s9  ;;  %s2557_s21 = sshll.u32 %s3907_s28, 3 }
  0x58   : > { %2633 = vmatpush1.bf16.msra.mxu0 %v2632_v36  ;;  %v385_v56 = vld [vmem:[%s3679_s16 + $0x120] sm:$0xff]  ;;  %v2670_v58 = vpack.c.bf16 %v388_v51, %v384_v50  ;;  %v387_v59 = vld [vmem:[%s3679_s16 + $0x130] sm:$0xff]  ;;  %v390_v60 = vld [vmem:[%s3679_s16 + $0x148] sm:$0xff]  ;;  %s959_s11 = scalar_lea.vmem %s4186_s18, %s2557_s21  ;;  %s2564_s8 = sshll.u32 %s3946_s30, 3 }
  0x59   : > { %2665 = vmatpush1.bf16.msra.mxu1 %v2664_v40  ;;  %2635 = vmatprep.subr.bf16.mxu0 %v2634_v41  ;;  %v394_v61 = vld [vmem:[%s3679_s16 + $0x168] sm:$0xff]  ;;  %v392_v62 = vld [vmem:[%s3679_s16 + $0x158] sm:$0xff]  ;;  %v2640_v2 = vpack.c.bf16 %v385_v56, %v381_v55  ;;  %v2672_v3 = vpack.c.bf16 %v387_v59, %v383_v57  ;;  %v389_v5 = vld [vmem:[%s3679_s16 + $0x140] sm:$0xff]  ;;  %s2578_s7 = sshll.u32 %s3959_s17, 3 }
  0x5a   : > { %2667 = vmatprep.subr.bf16.mxu1 %v2666_v45  ;;  %v396_v63 = vld [vmem:[%s3679_s16 + $0x178] sm:$0xff]  ;;  %v2642_v4 = vpack.c.bf16 %v394_v61, %v390_v60  ;;  %v393_v6 = vld [vmem:[%s3679_s16 + $0x160] sm:$0xff]  ;;  %v391_v7 = vld [vmem:[%s3679_s16 + $0x150] sm:$0xff]  ;;  %s1562_s21 = scalar_lea.vmem %s4186_s18, %s2578_s7  ;;  %s2606_s7 = sshll.u32 %s4048_s12, 3 }
  0x5b   : > { %v2674_v8 = vpack.c.bf16 %v396_v63, %v392_v62  ;;  %v395_v9 = vld [vmem:[%s3679_s16 + $0x170] sm:$0xff]  ;;  %v398_v10 = vld [vmem:[%s3679_s16 + $0x188] sm:$0xff]  ;;  %v400_v12 = vld [vmem:[%s3679_s16 + $0x198] sm:$0xff]  ;;  %v2644_v14 = vpack.c.bf16 %v393_v6, %v389_v5 }
  0x5c   : > { %2637 = vmatpush1.bf16.msra.mxu0 %v2636_v52  ;;  %v402_v11 = vld [vmem:[%s3679_s16 + $0x1a8] sm:$0xff]  ;;  %v404_v13 = vld [vmem:[%s3679_s16 + $0x1b8] sm:$0xff]  ;;  %v2676_v15 = vpack.c.bf16 %v395_v9, %v391_v7  ;;  %v397_v17 = vld [vmem:[%s3679_s16 + $0x180] sm:$0xff] }
  0x5d   : > { %2669 = vmatpush1.bf16.msra.mxu1 %v2668_v53  ;;  %2639 = vmatprep.subr.bf16.mxu0 %v2638_v54  ;;  %v2646_v16 = vpack.c.bf16 %v402_v11, %v398_v10  ;;  %v401_v18 = vld [vmem:[%s3679_s16 + $0x1a0] sm:$0xff]  ;;  %v399_v19 = vld [vmem:[%s3679_s16 + $0x190] sm:$0xff]  ;;  %v2678_v20 = vpack.c.bf16 %v404_v13, %v400_v12  ;;  %v406_v22 = vld [vmem:[%s3679_s16 + $0x1c8] sm:$0xff] }
  0x5e   : > { %2671 = vmatprep.subr.bf16.mxu1 %v2670_v58  ;;  %v403_v21 = vld [vmem:[%s3679_s16 + $0x1b0] sm:$0xff]  ;;  %v410_v23 = vld [vmem:[%s3679_s16 + $0x1e8] sm:$0xff]  ;;  %v408_v24 = vld [vmem:[%s3679_s16 + $0x1d8] sm:$0xff]  ;;  %v2648_v26 = vpack.c.bf16 %v401_v18, %v397_v17 }
  0x5f   : > { %v412_v25 = vld [vmem:[%s3679_s16 + $0x1f8] sm:$0xff]  ;;  %v2680_v27 = vpack.c.bf16 %v403_v21, %v399_v19  ;;  %v2650_v28 = vpack.c.bf16 %v410_v23, %v406_v22  ;;  %v405_v29 = vld [vmem:[%s3679_s16 + $0x1c0] sm:$0xff]  ;;  %v407_v31 = vld [vmem:[%s3679_s16 + $0x1d0] sm:$0xff] }
  0x60   : > { %2641 = vmatpush1.bf16.msra.mxu0 %v2640_v2  ;;  %v409_v30 = vld [vmem:[%s3679_s16 + $0x1e0] sm:$0xff]  ;;  %v2682_v32 = vpack.c.bf16 %v412_v25, %v408_v24  ;;  %v411_v33 = vld [vmem:[%s3679_s16 + $0x1f0] sm:$0xff]  ;;  %v696_v34 = vld [vmem:[%s3685_s15 + $0x8] sm:$0xff] }
  0x61   : > { %2673 = vmatpush1.bf16.msra.mxu1 %v2672_v3  ;;  %2643 = vmatprep.subr.bf16.mxu0 %v2642_v4  ;;  %v700_v35 = vld [vmem:[%s3685_s15 + $0x28] sm:$0xff]  ;;  %v698_v36 = vld [vmem:[%s3685_s15 + $0x18] sm:$0xff]  ;;  %v2652_v38 = vpack.c.bf16 %v409_v30, %v405_v29  ;;  %v2684_v39 = vpack.c.bf16 %v411_v33, %v407_v31  ;;  %v695_v41 = vld [vmem:[%s3685_s15] sm:$0xff] }
  0x62   : > { %2675 = vmatprep.subr.bf16.mxu1 %v2674_v8  ;;  %v702_v37 = vld [vmem:[%s3685_s15 + $0x38] sm:$0xff]  ;;  %v3763_v40 = vpack.c.bf16 %v700_v35, %v696_v34  ;;  %v699_v42 = vld [vmem:[%s3685_s15 + $0x20] sm:$0xff]  ;;  %v697_v44 = vld [vmem:[%s3685_s15 + $0x10] sm:$0xff] }
  0x63   : > { %v3767_v43 = vpack.c.bf16 %v702_v37, %v698_v36  ;;  %v701_v45 = vld [vmem:[%s3685_s15 + $0x30] sm:$0xff]  ;;  %v704_v46 = vld [vmem:[%s3685_s15 + $0x48] sm:$0xff]  ;;  %v341_v48 = vld [vmem:[%s4511_s0] sm:$0xff]  ;;  %v3779_v51 = vpack.c.bf16 %v699_v42, %v695_v41 }
  0x64   : > { %2645 = vmatpush1.bf16.msra.mxu0 %v2644_v14  ;;  %v708_v47 = vld [vmem:[%s3685_s15 + $0x68] sm:$0xff]  ;;  %v706_v49 = vld [vmem:[%s3685_s15 + $0x58] sm:$0xff]  ;;  %v3782_v52 = vpack.c.bf16 %v701_v45, %v697_v44  ;;  %v703_v54 = vld [vmem:[%s3685_s15 + $0x40] sm:$0xff] }
  0x65   : > { %2677 = vmatpush1.bf16.msra.mxu1 %v2676_v15  ;;  %2647 = vmatprep.subr.bf16.mxu0 %v2646_v16  ;;  %v710_v50 = vld [vmem:[%s3685_s15 + $0x78] sm:$0xff]  ;;  %v3784_v53 = vpack.c.bf16 %v708_v47, %v704_v46  ;;  %v707_v55 = vld [vmem:[%s3685_s15 + $0x60] sm:$0xff]  ;;  %v705_v56 = vld [vmem:[%s3685_s15 + $0x50] sm:$0xff] }
  0x66   : > { %2679 = vmatprep.subr.bf16.mxu1 %v2678_v20  ;;  %v3789_v57 = vpack.c.bf16 %v710_v50, %v706_v49  ;;  %v709_v58 = vld [vmem:[%s3685_s15 + $0x70] sm:$0xff]  ;;  %v712_v59 = vld [vmem:[%s3685_s15 + $0x88] sm:$0xff]  ;;  %v714_v62 = vld [vmem:[%s3685_s15 + $0x98] sm:$0xff]  ;;  %v3802_v2 = vpack.c.bf16 %v707_v55, %v703_v54 }
  0x67   : > { %v716_v60 = vld [vmem:[%s3685_s15 + $0xa8] sm:$0xff]  ;;  %v718_v63 = vld [vmem:[%s3685_s15 + $0xb8] sm:$0xff]  ;;  %v3806_v3 = vpack.c.bf16 %v709_v58, %v705_v56  ;;  %v711_v5 = vld [vmem:[%s3685_s15 + $0x80] sm:$0xff] }
  0x68   : > { %2649 = vmatpush1.bf16.msra.mxu0 %v2648_v26  ;;  %v342_v61 = vld [vmem:[%s4511_s0 + $0x8] sm:$0xff]  ;;  %v3808_v4 = vpack.c.bf16 %v716_v60, %v712_v59  ;;  %v715_v6 = vld [vmem:[%s3685_s15 + $0xa0] sm:$0xff]  ;;  %v713_v7 = vld [vmem:[%s3685_s15 + $0x90] sm:$0xff]  ;;  %v3814_v8 = vpack.c.bf16 %v718_v63, %v714_v62 }
  0x69   : > { %2681 = vmatpush1.bf16.msra.mxu1 %v2680_v27  ;;  %2651 = vmatprep.subr.bf16.mxu0 %v2650_v28  ;;  %v717_v9 = vld [vmem:[%s3685_s15 + $0xb0] sm:$0xff]  ;;  %v720_v10 = vld [vmem:[%s3685_s15 + $0xc8] sm:$0xff]  ;;  %v722_v13 = vld [vmem:[%s3685_s15 + $0xd8] sm:$0xff]  ;;  %v3827_v15 = vpack.c.bf16 %v715_v6, %v711_v5 }
  0x6a   : > { %2683 = vmatprep.subr.bf16.mxu1 %v2682_v32  ;;  %v724_v11 = vld [vmem:[%s3685_s15 + $0xe8] sm:$0xff]  ;;  %v343_v12 = vld [vmem:[%s4511_s0 + $0x10] sm:$0xff]  ;;  %v726_v14 = vld [vmem:[%s3685_s15 + $0xf8] sm:$0xff]  ;;  %v3831_v16 = vpack.c.bf16 %v717_v9, %v713_v7 }
  0x6b   : > { %v3833_v17 = vpack.c.bf16 %v724_v11, %v720_v10  ;;  %v719_v18 = vld [vmem:[%s3685_s15 + $0xc0] sm:$0xff]  ;;  %v721_v20 = vld [vmem:[%s3685_s15 + $0xd0] sm:$0xff]  ;;  %v3839_v21 = vpack.c.bf16 %v726_v14, %v722_v13  ;;  %v728_v23 = vld [vmem:[%s3685_s15 + $0x108] sm:$0xff] }
  0x6c   : > { %2653 = vmatpush1.bf16.msra.mxu0 %v2652_v38  ;;  %v723_v19 = vld [vmem:[%s3685_s15 + $0xe0] sm:$0xff]  ;;  %v725_v22 = vld [vmem:[%s3685_s15 + $0xf0] sm:$0xff]  ;;  %v732_v24 = vld [vmem:[%s3685_s15 + $0x128] sm:$0xff] }
  0x6d   : > { %2685 = vmatpush1.bf16.msra.mxu1 %v2684_v39  ;;  %2687 = vmatprep.subr.bf16.mxu0 %v3763_v40  ;;  %v344_v25 = vld [vmem:[%s4511_s0 + $0x18] sm:$0xff]  ;;  %v3852_v28 = vpack.c.bf16 %v723_v19, %v719_v18  ;;  %v3856_v29 = vpack.c.bf16 %v725_v22, %v721_v20  ;;  %v3858_v30 = vpack.c.bf16 %v732_v24, %v728_v23  ;;  %v727_v31 = vld [vmem:[%s3685_s15 + $0x100] sm:$0xff]  ;;  %v729_v33 = vld [vmem:[%s3685_s15 + $0x110] sm:$0xff]  ;;  %v935_v20 = vstv %s3907_s28  ;;  %s2613_s28 = sshll.u32 %s3946_s30, 5 }
  0x6e   : > { %2719 = vmatprep.subr.bf16.mxu1 %v3767_v43  ;;  %v730_v26 = vld [vmem:[%s3685_s15 + $0x118] sm:$0xff]  ;;  %v731_v32 = vld [vmem:[%s3685_s15 + $0x120] sm:$0xff]  ;;  %v733_v35 = vld [vmem:[%s3685_s15 + $0x130] sm:$0xff]  ;;  %s966_s13 = scalar_lea.vmem [#allocation2], %s2613_s28 }
  0x6f   : > { %500 = vmatmul.mubr.f32.vlgmr.msra.gmra.mrb[0].mxu0 %v341_v48  ;;  %v734_v27 = vld [vmem:[%s3685_s15 + $0x138] sm:$0xff]  ;;  %v736_v36 = vld [vmem:[%s3685_s15 + $0x148] sm:$0xff]  ;;  %v345_v38 = vld [vmem:[%s4511_s0 + $0x20] sm:$0xff]  ;;  %v3877_v42 = vpack.c.bf16 %v731_v32, %v727_v31  ;;  %v3882_v44 = vpack.c.bf16 %v733_v35, %v729_v33  ;;  %v415_v35 = vlaneseq }
  0x70   : > { %613 = vmatmul.mubr.f32.vlgmr.msra.gmra.mrb[0].mxu1 %v341_v48  ;;  %505 = vmatprep.mubr.f32.mxu0 %v3500_v0  ;;  %v3864_v34 = vpack.c.bf16 %v734_v27, %v730_v26  ;;  %v740_v37 = vld [vmem:[%s3685_s15 + $0x168] sm:$0xff]  ;;  %v738_v39 = vld [vmem:[%s3685_s15 + $0x158] sm:$0xff]  ;;  %v735_v46 = vld [vmem:[%s3685_s15 + $0x140] sm:$0xff]  ;;  %v1337_v26 = vstv %s3920_s14 }
  0x71   : > { %618 = vmatprep.mubr.f32.mxu1 %v3500_v0  ;;  %2689 = vmatpush1.bf16.msra.mxu0 %v3779_v51  ;;  %v742_v41 = vld [vmem:[%s3685_s15 + $0x178] sm:$0xff]  ;;  %v3884_v45 = vpack.c.bf16 %v740_v37, %v736_v36  ;;  %v739_v47 = vld [vmem:[%s3685_s15 + $0x160] sm:$0xff]  ;;  %v737_v48 = vld [vmem:[%s3685_s15 + $0x150] sm:$0xff]  ;;  %v1136_v37 = vstv %s3946_s30  ;;  %s2614_s30 = sshll.u32 %s3920_s14, 5 }
  0x72   : > { %2721 = vmatpush1.bf16.msra.mxu1 %v3782_v52  ;;  %2691 = vmatprep.subr.bf16.mxu0 %v3784_v53  ;;  %v3890_v49 = vpack.c.bf16 %v742_v41, %v738_v39  ;;  %v741_v50 = vld [vmem:[%s3685_s15 + $0x170] sm:$0xff]  ;;  %v744_v54 = vld [vmem:[%s3685_s15 + $0x188] sm:$0xff]  ;;  %v746_v58 = vld [vmem:[%s3685_s15 + $0x198] sm:$0xff]  ;;  %v3903_v60 = vpack.c.bf16 %v739_v47, %v735_v46  ;;  %v1538_v41 = vstv %s3959_s17  ;;  %s1167_s20 = scalar_lea.vmem [#allocation2], %s2614_s30 }
  0x73   : > { %506 = vmatmul.mubr.f32.gmra.mrb[2].mxu0 %v342_v61  ;;  %2723 = vmatprep.subr.bf16.mxu1 %v3789_v57  ;;  %v748_v55 = vld [vmem:[%s3685_s15 + $0x1a8] sm:$0xff]  ;;  %v750_v59 = vld [vmem:[%s3685_s15 + $0x1b8] sm:$0xff]  ;;  %v743_v63 = vld [vmem:[%s3685_s15 + $0x180] sm:$0xff] }
  0x74   : > { %619 = vmatmul.mubr.f32.gmra.mrb[2].mxu1 %v342_v61  ;;  %511 = vmatprep.mubr.f32.mxu0 %v3500_v0  ;;  %v346_v56 = vld [vmem:[%s4511_s0 + $0x28] sm:$0xff]  ;;  %v3911_v61 = vpack.c.bf16 %v741_v50, %v737_v48  ;;  %v3913_v62 = vpack.c.bf16 %v748_v55, %v744_v54  ;;  %v747_v5 = vld [vmem:[%s3685_s15 + $0x1a0] sm:$0xff]  ;;  %v745_v6 = vld [vmem:[%s3685_s15 + $0x190] sm:$0xff]  ;;  %v3923_v7 = vpack.c.bf16 %v750_v59, %v746_v58  ;;  %v1940_v55 = vstv %s3996_s27 }
  0x75   : > { %624 = vmatprep.mubr.f32.mxu1 %v3500_v0  ;;  %2693 = vmatpush1.bf16.msra.mxu0 %v3802_v2  ;;  %v749_v9 = vld [vmem:[%s3685_s15 + $0x1b0] sm:$0xff]  ;;  %v752_v10 = vld [vmem:[%s3685_s15 + $0x1c8] sm:$0xff]  ;;  %v754_v13 = vld [vmem:[%s3685_s15 + $0x1d8] sm:$0xff]  ;;  %v3936_v18 = vpack.c.bf16 %v747_v5, %v743_v63  ;;  %v2141_v63 = vstv %s4021_s10 }
  0x76   : > { %2725 = vmatpush1.bf16.msra.mxu1 %v3806_v3  ;;  %2695 = vmatprep.subr.bf16.mxu0 %v3808_v4  ;;  %v756_v11 = vld [vmem:[%s3685_s15 + $0x1e8] sm:$0xff]  ;;  %v758_v14 = vld [vmem:[%s3685_s15 + $0x1f8] sm:$0xff]  ;;  %v3941_v19 = vld [vmem:[%s4515_s4] sm:$0xff]  ;;  %v3950_v22 = vpack.c.bf16 %v749_v9, %v745_v6 }
  0x77   : > { %512 = vmatmul.mubr.f32.gmra.mrb[4].mxu0 %v343_v12  ;;  %2727 = vmatprep.subr.bf16.mxu1 %v3814_v8  ;;  %v3952_v23 = vpack.c.bf16 %v756_v11, %v752_v10  ;;  %v751_v24 = vld [vmem:[%s3685_s15 + $0x1c0] sm:$0xff]  ;;  %v3962_v27 = vpack.c.bf16 %v758_v14, %v754_v13  ;;  %v753_v31 = vld [vmem:[%s3685_s15 + $0x1d0] sm:$0xff]  ;;  %v348_v33 = vld [vmem:[%s4511_s0 + $0x38] sm:$0xff]  ;;  %vm3971_vm0 = vcmp.gt.s32.totalorder %v3941_v19, %v935_v20  ;;  %v2342_v13 = vstv %s4048_s12 }
  0x78   : > { %625 = vmatmul.mubr.f32.gmra.mrb[4].mxu1 %v343_v12  ;;  %517 = vmatprep.mubr.f32.mxu0 %v3500_v0  ;;  %v347_v12 = vld [vmem:[%s4511_s0 + $0x30] sm:$0xff]  ;;  %vm3981_vm1 = vcmp.gt.s32.totalorder %v3941_v19, %v1337_v26  ;;  %v937_v46 = vsel %vm3971_vm0, 1, %v3501_v1  ;;  %vm4004_vm2 = vcmp.gt.s32.totalorder %v3941_v19, %v1136_v37  ;;  %vm4015_vm3 = vcmp.gt.s32.totalorder %v3941_v19, %v1538_v41  ;;  %v413_v41 = vld [vmem:[%s330_s19] sm:$0xf]  ;;  %s1160_s19 = scalar_lea.vmem %s4186_s18, %s2564_s8 }
  0x79   : > { %630 = vmatprep.mubr.f32.mxu1 %v3500_v0  ;;  %2697 = vmatpush1.bf16.msra.mxu0 %v3827_v15  ;;  %v757_v32 = vld [vmem:[%s3685_s15 + $0x1f0] sm:$0xff]  ;;  %v1339_v48 = vsel %vm3981_vm1, 1, %v3501_v1  ;;  %v1540_v59 = vsel %vm4015_vm3, 1, %v3501_v1  ;;  %vm4042_vm5 = vcmp.gt.s32.totalorder %v3941_v19, %v1940_v55  ;;  %v2556_v9 = vsel %vm3971_vm0, 1.0, %v3500_v0 }
  0x7a   : > { %2729 = vmatpush1.bf16.msra.mxu1 %v3831_v16  ;;  %2699 = vmatprep.subr.bf16.mxu0 %v3833_v17  ;;  %v3991_v39 = vpack.c.bf16 %v757_v32, %v753_v31  ;;  %v2563_v10 = vsel %vm4004_vm2, 1.0, %v3500_v0  ;;  %vm4063_vm6 = vcmp.gt.s32.totalorder %v3941_v19, %v2141_v63  ;;  %v2570_v14 = vsel %vm3981_vm1, 1.0, %v3500_v0 }
  0x7b   : > { %518 = vmatmul.mubr.f32.gmra.mrb[6].mxu0 %v344_v25  ;;  %2731 = vmatprep.subr.bf16.mxu1 %v3839_v21  ;;  %v2577_v20 = vsel %vm4015_vm3, 1.0, %v3500_v0  ;;  %vm4087_vm7 = vcmp.gt.s32.totalorder %v3941_v19, %v2342_v13  ;;  %v2598_v32 = vsel %vm4063_vm6, 1.0, %v3500_v0  ;;  %v416_v37 = vshrl.u32 %v415_v35, 7 }
  0x7c   : > { %631 = vmatmul.mubr.f32.gmra.mrb[6].mxu1 %v344_v25  ;;  %523 = vmatprep.mubr.f32.mxu0 %v3500_v0  ;;  %v755_v25 = vld [vmem:[%s3685_s15 + $0x1e0] sm:$0xff]  ;;  %s3987_s15 = scalar_select %p340_p8, 3, 4  ;;  %v3253_v31 = vpack.i.bf16 %v2577_v20, %v2570_v14 }
  0x7d   : > { %636 = vmatprep.mubr.f32.mxu1 %v3500_v0  ;;  %2701 = vmatpush1.bf16.msra.mxu0 %v3852_v28  ;;  %v3977_v36 = vpack.c.bf16 %v755_v25, %v751_v24  ;;  %v2143_v24 = vsel %vm4063_vm6, 1, %v3501_v1  ;;  %v3248_v25 = vpack.i.bf16 %v2563_v10, %v2556_v9  ;;  %v425_v47 = vsub.s32 2, %v416_v37 }
  0x7e   : > { %2733 = vmatpush1.bf16.msra.mxu1 %v3856_v29  ;;  %2703 = vmatprep.subr.bf16.mxu0 %v3858_v30  ;;  %v1739_v50 = vstv %s3987_s15  ;;  %s2585_s28 = sshll.u32 %s3987_s15, 3 }
  0x7f   : > { %524 = vmatmul.mubr.f32.gmra.mrb[8].mxu0 %v345_v38  ;;  %2735 = vmatprep.subr.bf16.mxu1 %v3864_v34  ;;  %vm4031_vm4 = vcmp.gt.s32.totalorder %v3941_v19, %v1739_v50  ;;  %v2605_v19 = vsel %vm4087_vm7, 1.0, %v3500_v0  ;;  %v4134_v55 = vrot.slane %v413_v41, %v425_v47 }
  0x80   : > { %637 = vmatmul.mubr.f32.gmra.mrb[8].mxu1 %v345_v38  ;;  %529 = vmatprep.mubr.f32.mxu0 %v3500_v0  ;;  %v1741_v6 = vsel %vm4031_vm4, 1, %v3501_v1  ;;  %v417_v38 = vsub.s32 0, %v416_v37 }
  0x81   : > { %642 = vmatprep.mubr.f32.mxu1 %v3500_v0  ;;  %2705 = vmatpush1.bf16.msra.mxu0 %v3877_v42 }
  0x82   : > { %2737 = vmatpush1.bf16.msra.mxu1 %v3882_v44  ;;  %2707 = vmatprep.subr.bf16.mxu0 %v3884_v45  ;;  %v4130_v50 = vrot.slane %v413_v41, %v417_v38 }
  0x83   : > { %530 = vmatmul.mubr.f32.gmra.mrb[10].mxu0 %v346_v56  ;;  %2739 = vmatprep.subr.bf16.mxu1 %v3890_v49 }
  0x84   : > { %643 = vmatmul.mubr.f32.gmra.mrb[10].mxu1 %v346_v56  ;;  %535 = vmatprep.mubr.f32.mxu0 %v3500_v0  ;;  %v1138_v56 = vsel %vm4004_vm2, 1, %v3501_v1 }
  0x85   : > { %648 = vmatprep.mubr.f32.mxu1 %v3500_v0  ;;  %2709 = vmatpush1.bf16.msra.mxu0 %v3903_v60 }
  0x86   : > { %2741 = vmatpush1.bf16.msra.mxu1 %v3911_v61  ;;  %2711 = vmatprep.subr.bf16.mxu0 %v3913_v62 }
  0x87   : > { %536 = vmatmul.mubr.f32.gmra.mrb[12].mxu0 %v347_v12  ;;  %2743 = vmatprep.subr.bf16.mxu1 %v3923_v7 }
  0x88   : > { %649 = vmatmul.mubr.f32.gmra.mrb[12].mxu1 %v347_v12  ;;  %541 = vmatprep.mubr.f32.mxu0 %v3500_v0  ;;  %v1942_v12 = vsel %vm4042_vm5, 1, %v3501_v1 }
  0x89   : > { %654 = vmatprep.mubr.f32.mxu1 %v3500_v0  ;;  %2713 = vmatpush1.bf16.msra.mxu0 %v3936_v18 }
  0x8a   : > { %2745 = vmatpush1.bf16.msra.mxu1 %v3950_v22  ;;  %2715 = vmatprep.subr.bf16.mxu0 %v3952_v23 }
  0x8b   : > { %542 = vmatmul.mubr.f32.gmra.mrb[14].mxu0 %v348_v33  ;;  %2747 = vmatprep.subr.bf16.mxu1 %v3962_v27 }
  0x8c   : > { %655 = vmatmul.mubr.f32.gmra.mrb[14].mxu1 %v348_v33  ;;  %834 = vmatprep.mubr.f32.mxu0 %v3500_v0  ;;  %v3263_v33 = vpack.i.bf16 %v2605_v19, %v2598_v32 }
  0x8d   : > { %2717 = vmatpush1.bf16.msra.mxu0 %v3977_v36  ;;  %905 = vmatprep.mubr.f32.mxu1 %v3500_v0 }
  0x8e   : > { %2749 = vmatpush1.bf16.msra.mxu1 %v3991_v39  ;;  %945 = vperm.xlu0 %3246, %v937_v46   ;;  %v421_v46 = vsub.s32 1, %v416_v37 }
  0x8f   : > { %1347 = vperm.xlu1 %3247, %v1339_v48   ;;  %2751 = vmatprep.subr.bf16.mxu0 %v3763_v40  ;;  %v429_v48 = vsub.s32 3, %v416_v37 }
  0x90   : > { %835 = vmatmul.mubr.f32.vlgmr.msra.gmra.mrb[16].mxu0 %v3500_v0  ;;  %2783 = vmatprep.subr.bf16.mxu1 %v3767_v43  ;;  %v4132_v54 = vrot.slane %v413_v41, %v421_v46 }
  0x91   : > { %906 = vmatmul.mubr.f32.vlgmr.msra.gmra.mrb[16].mxu1 %v3500_v0  ;;  %2753 = vmatpush1.bf16.msra.mxu0 %v3779_v51 }
  0x92   : > { %1146 = vperm.xlu0 %3246, %v1138_v56   ;;  %2785 = vmatpush1.bf16.msra.mxu1 %v3782_v52  ;;  %v4136_v56 = vrot.slane %v413_v41, %v429_v48 }
  0x93   : > { %1548 = vperm.xlu1 %3247, %v1540_v59   ;;  %2755 = vmatprep.subr.bf16.mxu0 %v3784_v53 }
  0x94   : > { %2787 = vmatprep.subr.bf16.mxu1 %v3789_v57  ;;  %1035 = vmatprep.mubr.f32.mxu0 %v3500_v0 }
  0x95   : > { %2757 = vmatpush1.bf16.msra.mxu0 %v3802_v2  ;;  %1106 = vmatprep.mubr.f32.mxu1 %v3500_v0 }
  0x96   : > { %1749 = vperm.xlu0 %3246, %v1741_v6   ;;  %2789 = vmatpush1.bf16.msra.mxu1 %v3806_v3 }
  0x97   : > { %1950 = vperm.xlu1 %3247, %v1942_v12   ;;  %2759 = vmatprep.subr.bf16.mxu0 %v3808_v4 }
  0x98   : > { %2791 = vmatprep.subr.bf16.mxu1 %v3814_v8 }
  0x99   : > { %2761 = vmatpush1.bf16.msra.mxu0 %v3827_v15 }
  0x9a   : > { %2151 = vperm.xlu0 %3246, %v2143_v24   ;;  %2793 = vmatpush1.bf16.msra.mxu1 %v3831_v16 }
  0x9b   : > { %3249 = vperm.xlu1 %3247, %v3248_v25   ;;  %2763 = vmatprep.subr.bf16.mxu0 %v3833_v17 }
  0x9c   : > { %2795 = vmatprep.subr.bf16.mxu1 %v3839_v21 }
  0x9d   : > { %2765 = vmatpush1.bf16.msra.mxu0 %v3852_v28 }
  0x9e   : > { %3254 = vperm.xlu0 %3246, %v3253_v31   ;;  %2797 = vmatpush1.bf16.msra.mxu1 %v3856_v29 }
  0x9f   : > { %2767 = vmatprep.subr.bf16.mxu0 %v3858_v30  ;;  %2799 = vmatprep.subr.bf16.mxu1 %v3864_v34 }
  0xa1   : > { %2769 = vmatpush1.bf16.msra.mxu0 %v3877_v42 }
  0xa2   : > { %3264 = vperm.xlu0 %3246, %v3263_v33   ;;  %2801 = vmatpush1.bf16.msra.mxu1 %v3882_v44 }
  0xa3   : > { %2771 = vmatprep.subr.bf16.mxu0 %v3884_v45  ;;  %2803 = vmatprep.subr.bf16.mxu1 %v3890_v49 }
  0xa5   : > { %2773 = vmatpush1.bf16.msra.mxu0 %v3903_v60 }
  0xa6   : > { %2805 = vmatpush1.bf16.msra.mxu1 %v3911_v61  ;;  %2775 = vmatprep.subr.bf16.mxu0 %v3913_v62 }
  0xa7   : > { %2807 = vmatprep.subr.bf16.mxu1 %v3923_v7 }
  0xa9   : > { %2777 = vmatpush1.bf16.msra.mxu0 %v3936_v18 }
  0xaa   : > { %2809 = vmatpush1.bf16.msra.mxu1 %v3950_v22  ;;  %2779 = vmatprep.subr.bf16.mxu0 %v3952_v23 }
  0xab   : > { %2811 = vmatprep.subr.bf16.mxu1 %v3962_v27 }
  0xad   : > { %2781 = vmatpush1.bf16.msra.mxu0 %v3977_v36 }
  0xae   : > { %2813 = vmatpush1.bf16.msra.mxu1 %v3991_v39  ;;  %2815 = vmatprep.subr.bf16.mxu0 %v3763_v40 }
  0xaf   : > { %2847 = vmatprep.subr.bf16.mxu1 %v3767_v43 }
 0x142   : > { %v501_v59 = vpop.f32.mrb[0].mxu0 }
 0x143   : > { %v502_v63 = vadd.f32 %v501_v59, %v4130_v50  ;;  %v503_v6 = vpop.f32.mrb[1].mxu0  ;;  %v614_v9 = vpop.f32.mrb[0].mxu1 }
 0x144   : > { %v504_v10 = vadd.f32 %v503_v6, %v4132_v54  ;;  %v615_v11 = vadd.f32 %v614_v9, %v4134_v55  ;;  %v616_v12 = vpop.f32.mrb[1].mxu1 }
 0x145   : > { %661 = vst [vmem:[#allocation2] sm:$0xff] %v502_v63  ;;  %v617_v13 = vadd.f32 %v616_v12, %v4136_v56 }
 0x146   : > { %662 = vst [vmem:[#allocation2 + $0x8] sm:$0xff] %v504_v10  ;;  %v507_v14 = vpop.f32.mrb[2].mxu0  ;;  %663 = vst [vmem:[#allocation2 + $0x10] sm:$0xff] %v615_v11 }
 0x147   : > { %v508_v20 = vadd.f32 %v507_v14, %v4130_v50  ;;  %v509_v24 = vpop.f32.mrb[3].mxu0  ;;  %664 = vst [vmem:[#allocation2 + $0x18] sm:$0xff] %v617_v13  ;;  %v620_v25 = vpop.f32.mrb[2].mxu1 }
 0x148   : > { %v510_v31 = vadd.f32 %v509_v24, %v4132_v54  ;;  %v621_v32 = vadd.f32 %v620_v25, %v4134_v55  ;;  %v622_v19 = vpop.f32.mrb[3].mxu1 }
 0x149   : > { %665 = vst [vmem:[#allocation2 + $0x20] sm:$0xff] %v508_v20  ;;  %v623_v33 = vadd.f32 %v622_v19, %v4136_v56 }
 0x14a   : > { %666 = vst [vmem:[#allocation2 + $0x28] sm:$0xff] %v510_v31  ;;  %v513_v35 = vpop.f32.mrb[4].mxu0  ;;  %667 = vst [vmem:[#allocation2 + $0x30] sm:$0xff] %v621_v32 }
 0x14b   : > { %v514_v37 = vadd.f32 %v513_v35, %v4130_v50  ;;  %v515_v38 = vpop.f32.mrb[5].mxu0  ;;  %668 = vst [vmem:[#allocation2 + $0x38] sm:$0xff] %v623_v33  ;;  %v626_v41 = vpop.f32.mrb[4].mxu1 }
 0x14c   : > { %v516_v46 = vadd.f32 %v515_v38, %v4132_v54  ;;  %v627_v47 = vadd.f32 %v626_v41, %v4134_v55  ;;  %v628_v48 = vpop.f32.mrb[5].mxu1 }
 0x14d   : > { %669 = vst [vmem:[#allocation2 + $0x40] sm:$0xff] %v514_v37  ;;  %v629_v59 = vadd.f32 %v628_v48, %v4136_v56 }
 0x14e   : > { %670 = vst [vmem:[#allocation2 + $0x48] sm:$0xff] %v516_v46  ;;  %v519_v63 = vpop.f32.mrb[6].mxu0  ;;  %671 = vst [vmem:[#allocation2 + $0x50] sm:$0xff] %v627_v47 }
 0x14f   : > { %v520_v6 = vadd.f32 %v519_v63, %v4130_v50  ;;  %v521_v9 = vpop.f32.mrb[7].mxu0  ;;  %672 = vst [vmem:[#allocation2 + $0x58] sm:$0xff] %v629_v59  ;;  %v632_v10 = vpop.f32.mrb[6].mxu1 }
 0x150   : > { %v522_v11 = vadd.f32 %v521_v9, %v4132_v54  ;;  %v633_v12 = vadd.f32 %v632_v10, %v4134_v55  ;;  %v634_v13 = vpop.f32.mrb[7].mxu1 }
 0x151   : > { %673 = vst [vmem:[#allocation2 + $0x60] sm:$0xff] %v520_v6  ;;  %v635_v14 = vadd.f32 %v634_v13, %v4136_v56 }
 0x152   : > { %674 = vst [vmem:[#allocation2 + $0x68] sm:$0xff] %v522_v11  ;;  %v525_v20 = vpop.f32.mrb[8].mxu0  ;;  %675 = vst [vmem:[#allocation2 + $0x70] sm:$0xff] %v633_v12 }
 0x153   : > { %v526_v24 = vadd.f32 %v525_v20, %v4130_v50  ;;  %v527_v25 = vpop.f32.mrb[9].mxu0  ;;  %676 = vst [vmem:[#allocation2 + $0x78] sm:$0xff] %v635_v14  ;;  %v638_v31 = vpop.f32.mrb[8].mxu1 }
 0x154   : > { %v528_v32 = vadd.f32 %v527_v25, %v4132_v54  ;;  %v639_v19 = vadd.f32 %v638_v31, %v4134_v55  ;;  %v640_v33 = vpop.f32.mrb[9].mxu1 }
 0x155   : > { %677 = vst [vmem:[#allocation2 + $0x80] sm:$0xff] %v526_v24  ;;  %v641_v35 = vadd.f32 %v640_v33, %v4136_v56 }
 0x156   : > { %678 = vst [vmem:[#allocation2 + $0x88] sm:$0xff] %v528_v32  ;;  %v531_v37 = vpop.f32.mrb[10].mxu0  ;;  %679 = vst [vmem:[#allocation2 + $0x90] sm:$0xff] %v639_v19 }
 0x157   : > { %v532_v38 = vadd.f32 %v531_v37, %v4130_v50  ;;  %v533_v41 = vpop.f32.mrb[11].mxu0  ;;  %680 = vst [vmem:[#allocation2 + $0x98] sm:$0xff] %v641_v35  ;;  %v644_v46 = vpop.f32.mrb[10].mxu1 }
 0x158   : > { %v534_v47 = vadd.f32 %v533_v41, %v4132_v54  ;;  %v645_v48 = vadd.f32 %v644_v46, %v4134_v55  ;;  %v646_v59 = vpop.f32.mrb[11].mxu1 }
 0x159   : > { %681 = vst [vmem:[#allocation2 + $0xa0] sm:$0xff] %v532_v38  ;;  %v647_v63 = vadd.f32 %v646_v59, %v4136_v56 }
 0x15a   : > { %682 = vst [vmem:[#allocation2 + $0xa8] sm:$0xff] %v534_v47  ;;  %683 = vst [vmem:[#allocation2 + $0xb0] sm:$0xff] %v645_v48  ;;  %v537_v6 = vpop.f32.mrb[12].mxu0 }
 0x15b   : > { %684 = vst [vmem:[#allocation2 + $0xb8] sm:$0xff] %v647_v63  ;;  %v538_v9 = vadd.f32 %v537_v6, %v4130_v50  ;;  %v650_v10 = vpop.f32.mrb[12].mxu1  ;;  %v539_v11 = vpop.f32.mrb[13].mxu0 }
 0x15c   : > { %v651_v12 = vadd.f32 %v650_v10, %v4134_v55  ;;  %v540_v13 = vadd.f32 %v539_v11, %v4132_v54  ;;  %v652_v14 = vpop.f32.mrb[13].mxu1 }
 0x15d   : > { %685 = vst [vmem:[#allocation2 + $0xc0] sm:$0xff] %v538_v9  ;;  %v653_v20 = vadd.f32 %v652_v14, %v4136_v56 }
 0x15e   : > { %687 = vst [vmem:[#allocation2 + $0xd0] sm:$0xff] %v651_v12  ;;  %686 = vst [vmem:[#allocation2 + $0xc8] sm:$0xff] %v540_v13  ;;  %v543_v24 = vpop.f32.mrb[14].mxu0 }
 0x15f   : > { %688 = vst [vmem:[#allocation2 + $0xd8] sm:$0xff] %v653_v20  ;;  %v544_v25 = vadd.f32 %v543_v24, %v4130_v50  ;;  %v656_v31 = vpop.f32.mrb[14].mxu1  ;;  %v545_v32 = vpop.f32.mrb[15].mxu0 }
 0x160   : > { %v657_v19 = vadd.f32 %v656_v31, %v4134_v55  ;;  %v546_v33 = vadd.f32 %v545_v32, %v4132_v54  ;;  %v658_v35 = vpop.f32.mrb[15].mxu1  ;;  %v4171_v24 = vpop.permute.xlu1 %1347 }
 0x161   : > { %689 = vst [vmem:[#allocation2 + $0xe0] sm:$0xff] %v544_v25  ;;  %v659_v37 = vadd.f32 %v658_v35, %v4136_v56  ;;  %vm1349_vm10 = vcmp.eq.s32.totalorder %v4171_v24, 1 }
 0x162   : > { %691 = vst [vmem:[#allocation2 + $0xf0] sm:$0xff] %v657_v19  ;;  %690 = vst [vmem:[#allocation2 + $0xe8] sm:$0xff] %v546_v33 }
 0x163   : > { %692 = vst [vmem:[#allocation2 + $0xf8] sm:$0xff] %v659_v37  ;;  %v836_v38 = vpop.f32.mrb[16].mxu0 }
 0x164   : > { %v838_v41 = vpop.f32.mrb[17].mxu0  ;;  %v907_v46 = vpop.f32.mrb[16].mxu1 }
 0x165   : > { %v909_v47 = vpop.f32.mrb[17].mxu1  ;;  %v4173_v19 = vpop.permute.xlu1 %1548 }
 0x166   : > { %vm1550_vm11 = vcmp.eq.s32.totalorder %v4173_v19, 1 }
 0x16a   : > { %v766_v50 = vld [vmem:[%s765_s24] sm:$0xff]  ;;  %v767_v59 = vld [vmem:[%s765_s24 + $0x8] sm:$0xff]  ;;  %v769_v54 = vld [vmem:[%s765_s24 + $0x18] sm:$0xff] }
 0x16b   : > { %v912_v48 = vadd.f32 %v836_v38, %v766_v50  ;;  %v913_v63 = vadd.f32 %v838_v41, %v767_v59  ;;  %v915_v9 = vadd.f32 %v909_v47, %v769_v54  ;;  %v768_v56 = vld [vmem:[%s765_s24 + $0x10] sm:$0xff]  ;;  %v946_v41 = vpop.permute.xlu0 %945  ;;  %v4178_v50 = vpop.permute.xlu1 %1950  ;;  %s2571_s24 = sshll.u32 %s3920_s14, 3  ;;  %s2615_s14 = sshll.u32 %s3959_s17, 5 }
 0x16c   : > { %v914_v11 = vadd.f32 %v907_v46, %v768_v56  ;;  %vm947_vm8 = vcmp.eq.s32.totalorder %v946_v41, 1  ;;  %v2584_v56 = vsel %vm4031_vm4, 1.0, %v3500_v0  ;;  %v969_v41 = vld [vmem:[%s966_s13 + $0x10] sm:$0xff]  ;;  %s1361_s9 = scalar_lea.vmem %s4186_s18, %s2571_s24  ;;  %s1368_s16 = scalar_lea.vmem [#allocation2], %s2615_s14  ;;  %vm1952_vm13 = vcmp.eq.s32.totalorder %v4178_v50, 1 }
 0x16d   : > { %v2553_v55 = vmul.f32 -1.442695, %v912_v48  ;;  %v2554_v6 = vmul.f32 -1.442695, %v913_v63  ;;  %v2555_v10 = vmul.f32 -1.442695, %v915_v9 }
 0x16e   : > { %s2616_s17 = sshll.u32 %s3987_s15, 5  ;;  %s2617_s15 = sshll.u32 %s3996_s27, 5 }
 0x16f   : > { %3268 = vpow2.f32 %v2553_v55  ;;  %v4181_v48 = vpop.permute.xlu1 %3249  ;;  %s1770_s8 = scalar_lea.vmem [#allocation2], %s2617_s15  ;;  %s2599_s24 = sshll.u32 %s4021_s10, 3 }
 0x170   : > { %3270 = vpow2.f32 %v2554_v6  ;;  %v3251_v63 = vunpack.i.l.bf16 %v4181_v48  ;;  %s2619_s14 = sshll.u32 %s4048_s12, 5 }
 0x171   : > { %3272 = vpow2.f32 %v2555_v10  ;;  %v2591_v10 = vsel %vm4042_vm5, 1.0, %v3500_v0 }
 0x172   : > { %3274 = vtanh.f32 %v914_v11  ;;  %v3258_v11 = vpack.i.bf16 %v2591_v10, %v2584_v56 }
 0x174   : > { %3259 = vperm.xlu1 %3247, %v3258_v11  }
 0x179   : > { %v3269_v12 = vpop.eup %3268 }
 0x17a   : > { %v3271_v13 = vpop.eup %3270  ;;  %v919_v14 = vadd.f32 1.0, %v3269_v12  ;;  %v2344_v12 = vsel %vm4087_vm7, 1, %v3501_v1 }
 0x17b   : > { %v925_v20 = vadd.f32 1.0, %v3271_v13  ;;  %v3273_v25 = vpop.eup %3272  ;;  %2352 = vperm.xlu1 %3247, %v2344_v12   ;;  %v967_v13 = vld [vmem:[%s966_s13] sm:$0xff] }
 0x17c   : > { %3276 = vrcp.f32 %v919_v14  ;;  %v3275_v31 = vpop.eup %3274  ;;  %v932_v35 = vadd.f32 1.0, %v3273_v25 }
 0x17d   : > { %3278 = vrcp.f32 %v925_v20 }
 0x17e   : > { %3280 = vrcp.f32 %v932_v35 }
 0x186   : > { %v3277_v32 = vpop.eup %3276 }
 0x187   : > { %v3279_v33 = vpop.eup %3278  ;;  %v940_v37 = vmul.f32 %v3277_v32, %v3275_v31  ;;  %v968_v31 = vld [vmem:[%s966_s13 + $0x8] sm:$0xff] }
 0x188   : > { %v939_v38 = vmul.f32 0.0, %v3279_v33  ;;  %v3281_v59 = vpop.eup %3280 }
 0x18a   : > { %v941_v46 = vadd.f32 %v940_v37, %v939_v38  ;;  %v970_v37 = vld [vmem:[%s966_s13 + $0x18] sm:$0xff]  ;;  %s1763_s13 = scalar_lea.vmem %s4186_s18, %s2585_s28  ;;  %s2366_s28 = scalar_lea.vmem %s4186_s18, %s2606_s7 }
 0x18c   : > { %3282 = vtanh.f32 %v941_v46  ;;  %v4176_v47 = vsel %vm947_vm8, %v941_v46, 0.0 }
 0x196   : > { %v3283_v55 = vpop.eup %3282 }
 0x197   : > { %v943_v6 = vmul.f32 %v3283_v55, %v3281_v59 }
 0x199   : > { %v4192_v54 = vsel %vm947_vm8, %v943_v6, 0.0  ;;  %v957_v9 = vmul.f32 %v3251_v63, %v943_v6  ;;  %2620 = vmatmul.mubr.msk.f32.vlgmr.msra.gmra.mrb[18].mxu0 %vm947_vm8, %v943_v6  ;;  %2621 = vmatmul.mubr.msk.f32.vlgmr.msra.gmra.mrb[18].mxu1 %vm947_vm8, %v943_v6 }
 0x19a   : > { %2817 = vmatpush1.bf16.msra.mxu0 %v3779_v51  ;;  %2849 = vmatpush1.bf16.msra.mxu1 %v3782_v52 }
 0x19b   : > { %960 = vst [vmem:[%s959_s11] sm:$0xff] %v957_v9  ;;  %2819 = vmatprep.subr.bf16.mxu0 %v3784_v53  ;;  %2851 = vmatprep.subr.bf16.mxu1 %v3789_v57  ;;  %s1569_s11 = scalar_lea.vmem [#allocation2], %s2616_s17 }
 0x19c   : > { %1236 = vmatprep.mubr.f32.mxu0 %v3500_v0  ;;  %1307 = vmatprep.mubr.f32.mxu1 %v3500_v0  ;;  %v1570_v19 = vld [vmem:[%s1569_s11] sm:$0xff] }
 0x19e   : > { %2821 = vmatpush1.bf16.msra.mxu0 %v3802_v2  ;;  %2853 = vmatpush1.bf16.msra.mxu1 %v3806_v3 }
 0x19f   : > { %2823 = vmatprep.subr.bf16.mxu0 %v3808_v4  ;;  %2855 = vmatprep.subr.bf16.mxu1 %v3814_v8 }
 0x1a2   : > { %2825 = vmatpush1.bf16.msra.mxu0 %v3827_v15  ;;  %2857 = vmatpush1.bf16.msra.mxu1 %v3831_v16 }
 0x1a3   : > { %2827 = vmatprep.subr.bf16.mxu0 %v3833_v17  ;;  %2859 = vmatprep.subr.bf16.mxu1 %v3839_v21 }
 0x1a6   : > { %2829 = vmatpush1.bf16.msra.mxu0 %v3852_v28  ;;  %2861 = vmatpush1.bf16.msra.mxu1 %v3856_v29 }
 0x1a7   : > { %2831 = vmatprep.subr.bf16.mxu0 %v3858_v30  ;;  %2863 = vmatprep.subr.bf16.mxu1 %v3864_v34 }
 0x1aa   : > { %2833 = vmatpush1.bf16.msra.mxu0 %v3877_v42  ;;  %2865 = vmatpush1.bf16.msra.mxu1 %v3882_v44 }
 0x1ab   : > { %2835 = vmatprep.subr.bf16.mxu0 %v3884_v45  ;;  %2867 = vmatprep.subr.bf16.mxu1 %v3890_v49 }
 0x1ae   : > { %2837 = vmatpush1.bf16.msra.mxu0 %v3903_v60  ;;  %2869 = vmatpush1.bf16.msra.mxu1 %v3911_v61 }
 0x1af   : > { %2839 = vmatprep.subr.bf16.mxu0 %v3913_v62  ;;  %2871 = vmatprep.subr.bf16.mxu1 %v3923_v7 }
 0x1b2   : > { %2841 = vmatpush1.bf16.msra.mxu0 %v3936_v18  ;;  %2873 = vmatpush1.bf16.msra.mxu1 %v3950_v22 }
 0x1b3   : > { %2843 = vmatprep.subr.bf16.mxu0 %v3952_v23  ;;  %2875 = vmatprep.subr.bf16.mxu1 %v3962_v27 }
 0x1b6   : > { %2845 = vmatpush1.bf16.msra.mxu0 %v3977_v36  ;;  %2877 = vmatpush1.bf16.msra.mxu1 %v3991_v39 }
 0x1b7   : > { %2879 = vmatprep.subr.bf16.mxu0 %v3763_v40  ;;  %2911 = vmatprep.subr.bf16.mxu1 %v3767_v43 }
 0x26c   : > { %v1037_v14 = vpop.f32.mrb[18].mxu0  ;;  %v1108_v20 = vpop.f32.mrb[18].mxu1 }
 0x26d   : > { %v1113_v25 = vadd.f32 %v1037_v14, %v967_v13  ;;  %v1039_v58 = vpop.f32.mrb[19].mxu0  ;;  %v1110_v32 = vpop.f32.mrb[19].mxu1  ;;  %v1115_v1 = vadd.f32 %v1108_v20, %v969_v41 }
 0x26e   : > { %v1114_v33 = vadd.f32 %v1039_v58, %v968_v31  ;;  %v1116_v38 = vadd.f32 %v1110_v32, %v970_v37  ;;  %v1147_v14 = vpop.permute.xlu0 %1146  ;;  %v3252_v58 = vunpack.i.h.bf16 %v4181_v48 }
 0x26f   : > { %v2560_v35 = vmul.f32 -1.442695, %v1113_v25  ;;  %vm1148_vm9 = vcmp.eq.s32.totalorder %v1147_v14, 1 }
 0x270   : > { %v2561_v5 = vmul.f32 -1.442695, %v1114_v33  ;;  %v2562_v26 = vmul.f32 -1.442695, %v1116_v38  ;;  %v1169_v38 = vld [vmem:[%s1167_s20 + $0x8] sm:$0xff] }
 0x271   : > { %3284 = vpow2.f32 %v2560_v35 }
 0x272   : > { %3286 = vpow2.f32 %v2561_v5 }
 0x273   : > { %3288 = vpow2.f32 %v2562_v26 }
 0x274   : > { %3290 = vtanh.f32 %v1115_v1 }
 0x27b   : > { %v3285_v46 = vpop.eup %3284 }
 0x27c   : > { %v3287_v59 = vpop.eup %3286  ;;  %v1120_v63 = vadd.f32 1.0, %v3285_v46 }
 0x27d   : > { %v1126_v55 = vadd.f32 1.0, %v3287_v59  ;;  %v3289_v6 = vpop.eup %3288 }
 0x27e   : > { %3292 = vrcp.f32 %v1120_v63  ;;  %v3291_v9 = vpop.eup %3290  ;;  %v1133_v12 = vadd.f32 1.0, %v3289_v6  ;;  %v1171_v63 = vld [vmem:[%s1167_s20 + $0x18] sm:$0xff]  ;;  %v1170_v6 = vld [vmem:[%s1167_s20 + $0x10] sm:$0xff] }
 0x27f   : > { %3294 = vrcp.f32 %v1126_v55 }
 0x280   : > { %3296 = vrcp.f32 %v1133_v12 }
 0x288   : > { %v3293_v56 = vpop.eup %3292 }
 0x289   : > { %v3295_v10 = vpop.eup %3294  ;;  %v1141_v11 = vmul.f32 %v3293_v56, %v3291_v9 }
 0x28a   : > { %v1140_v13 = vmul.f32 %v3295_v10, %v4176_v47  ;;  %v3297_v31 = vpop.eup %3296 }
 0x28c   : > { %v1142_v20 = vadd.f32 %v1141_v11, %v1140_v13 }
 0x28e   : > { %3298 = vtanh.f32 %v1142_v20  ;;  %v4242_v25 = vsel %vm1148_vm9, %v1142_v20, %v4176_v47  ;;  %v1168_v47 = vld [vmem:[%s1167_s20] sm:$0xff] }
 0x298   : > { %v3299_v32 = vpop.eup %3298 }
 0x299   : > { %v1144_v33 = vmul.f32 %v3299_v32, %v3297_v31 }
 0x29b   : > { %v4248_v35 = vsel %vm1148_vm9, %v1144_v33, %v4192_v54  ;;  %v1158_v5 = vmul.f32 %v3252_v58, %v1144_v33 }
 0x29c   : > { %1237 = vmatmul.mubr.f32.vlgmr.msra.gmra.mrb[20].mxu0 %v4248_v35  ;;  %1308 = vmatmul.mubr.f32.vlgmr.msra.gmra.mrb[20].mxu1 %v4248_v35 }
 0x29d   : > { %1161 = vst [vmem:[%s1160_s19] sm:$0xff] %v1158_v5  ;;  %2881 = vmatpush1.bf16.msra.mxu0 %v3779_v51  ;;  %2913 = vmatpush1.bf16.msra.mxu1 %v3782_v52  ;;  %s2592_s19 = sshll.u32 %s3996_s27, 3  ;;  %s2618_s27 = sshll.u32 %s4021_s10, 5 }
 0x29e   : > { %2883 = vmatprep.subr.bf16.mxu0 %v3784_v53  ;;  %2915 = vmatprep.subr.bf16.mxu1 %v3789_v57  ;;  %s1964_s30 = scalar_lea.vmem %s4186_s18, %s2592_s19  ;;  %s1971_s20 = scalar_lea.vmem [#allocation2], %s2618_s27 }
 0x29f   : > { %1437 = vmatprep.mubr.f32.mxu0 %v3500_v0  ;;  %1508 = vmatprep.mubr.f32.mxu1 %v3500_v0  ;;  %s2550_s10 = sshll.u32 %s4545_s25, 3 }
 0x2a1   : > { %2885 = vmatpush1.bf16.msra.mxu0 %v3802_v2  ;;  %2917 = vmatpush1.bf16.msra.mxu1 %v3806_v3 }
 0x2a2   : > { %2887 = vmatprep.subr.bf16.mxu0 %v3808_v4  ;;  %2919 = vmatprep.subr.bf16.mxu1 %v3814_v8 }
 0x2a5   : > { %2889 = vmatpush1.bf16.msra.mxu0 %v3827_v15  ;;  %2921 = vmatpush1.bf16.msra.mxu1 %v3831_v16 }
 0x2a6   : > { %2891 = vmatprep.subr.bf16.mxu0 %v3833_v17  ;;  %2923 = vmatprep.subr.bf16.mxu1 %v3839_v21 }
 0x2a9   : > { %2893 = vmatpush1.bf16.msra.mxu0 %v3852_v28  ;;  %2925 = vmatpush1.bf16.msra.mxu1 %v3856_v29 }
 0x2aa   : > { %2895 = vmatprep.subr.bf16.mxu0 %v3858_v30  ;;  %2927 = vmatprep.subr.bf16.mxu1 %v3864_v34 }
 0x2ad   : > { %2897 = vmatpush1.bf16.msra.mxu0 %v3877_v42  ;;  %2929 = vmatpush1.bf16.msra.mxu1 %v3882_v44 }
 0x2ae   : > { %2899 = vmatprep.subr.bf16.mxu0 %v3884_v45  ;;  %2931 = vmatprep.subr.bf16.mxu1 %v3890_v49 }
 0x2b1   : > { %2901 = vmatpush1.bf16.msra.mxu0 %v3903_v60  ;;  %2933 = vmatpush1.bf16.msra.mxu1 %v3911_v61 }
 0x2b2   : > { %2903 = vmatprep.subr.bf16.mxu0 %v3913_v62  ;;  %2935 = vmatprep.subr.bf16.mxu1 %v3923_v7 }
 0x2b5   : > { %2905 = vmatpush1.bf16.msra.mxu0 %v3936_v18  ;;  %2937 = vmatpush1.bf16.msra.mxu1 %v3950_v22 }
 0x2b6   : > { %2907 = vmatprep.subr.bf16.mxu0 %v3952_v23  ;;  %2939 = vmatprep.subr.bf16.mxu1 %v3962_v27 }
 0x2b9   : > { %2909 = vmatpush1.bf16.msra.mxu0 %v3977_v36  ;;  %2941 = vmatpush1.bf16.msra.mxu1 %v3991_v39 }
 0x2ba   : > { %2943 = vmatprep.subr.bf16.mxu0 %v3763_v40  ;;  %2975 = vmatprep.subr.bf16.mxu1 %v3767_v43 }
 0x36f   : > { %v1238_v48 = vpop.f32.mrb[20].mxu0  ;;  %v1309_v54 = vpop.f32.mrb[20].mxu1 }
 0x370   : > { %v1314_v37 = vadd.f32 %v1238_v48, %v1168_v47  ;;  %v1240_v41 = vpop.f32.mrb[21].mxu0  ;;  %v1311_v26 = vpop.f32.mrb[21].mxu1  ;;  %v1316_v56 = vadd.f32 %v1309_v54, %v1170_v6  ;;  %v1370_v6 = vld [vmem:[%s1368_s16 + $0x8] sm:$0xff] }
 0x371   : > { %v1315_v1 = vadd.f32 %v1240_v41, %v1169_v38  ;;  %v1317_v55 = vadd.f32 %v1311_v26, %v1171_v63  ;;  %v4289_v47 = vpop.permute.xlu0 %1749 }
 0x372   : > { %v2567_v46 = vmul.f32 -1.442695, %v1314_v37  ;;  %vm1751_vm12 = vcmp.eq.s32.totalorder %v4289_v47, 1  ;;  %v1771_v47 = vld [vmem:[%s1770_s8] sm:$0xff] }
 0x373   : > { %v2568_v59 = vmul.f32 -1.442695, %v1315_v1  ;;  %v2569_v9 = vmul.f32 -1.442695, %v1317_v55 }
 0x374   : > { %3300 = vpow2.f32 %v2567_v46 }
 0x375   : > { %3302 = vpow2.f32 %v2568_v59  ;;  %v4294_v37 = vpop.permute.xlu0 %2151 }
 0x376   : > { %3304 = vpow2.f32 %v2569_v9  ;;  %vm2153_vm14 = vcmp.eq.s32.totalorder %v4294_v37, 1 }
 0x377   : > { %3306 = vtanh.f32 %v1316_v56 }
 0x379   : > { %v4297_v26 = vpop.permute.xlu0 %3254 }
 0x37a   : > { %v3256_v1 = vunpack.i.l.bf16 %v4297_v26 }
 0x37e   : > { %v3301_v10 = vpop.eup %3300 }
 0x37f   : > { %v3303_v11 = vpop.eup %3302  ;;  %v1321_v12 = vadd.f32 1.0, %v3301_v10 }
 0x380   : > { %v1327_v13 = vadd.f32 1.0, %v3303_v11  ;;  %v3305_v14 = vpop.eup %3304 }
 0x381   : > { %3308 = vrcp.f32 %v1321_v12  ;;  %v3307_v20 = vpop.eup %3306  ;;  %v1334_v33 = vadd.f32 1.0, %v3305_v14 }
 0x382   : > { %3310 = vrcp.f32 %v1327_v13  ;;  %v1372_v13 = vld [vmem:[%s1368_s16 + $0x18] sm:$0xff] }
 0x383   : > { %3312 = vrcp.f32 %v1334_v33 }
 0x38b   : > { %v3309_v31 = vpop.eup %3308 }
 0x38c   : > { %v3311_v58 = vpop.eup %3310  ;;  %v1342_v32 = vmul.f32 %v3309_v31, %v3307_v20  ;;  %v1371_v20 = vld [vmem:[%s1368_s16 + $0x10] sm:$0xff] }
 0x38d   : > { %v1341_v5 = vmul.f32 %v3311_v58, %v4242_v25  ;;  %v3313_v38 = vpop.eup %3312 }
 0x38f   : > { %v1343_v48 = vadd.f32 %v1342_v32, %v1341_v5 }
 0x391   : > { %3314 = vtanh.f32 %v1343_v48  ;;  %v4292_v54 = vsel %vm1349_vm10, %v1343_v48, %v4242_v25  ;;  %v1369_v25 = vld [vmem:[%s1368_s16] sm:$0xff]  ;;  %s2172_s16 = scalar_lea.vmem [#allocation2], %s2619_s14 }
 0x392   : > { %v2173_v37 = vld [vmem:[%s2172_s16] sm:$0xff] }
 0x39b   : > { %v3315_v41 = vpop.eup %3314 }
 0x39c   : > { %v1345_v46 = vmul.f32 %v3315_v41, %v3313_v38 }
 0x39e   : > { %v4302_v24 = vsel %vm1349_vm10, %v1345_v46, %v4248_v35  ;;  %v1359_v59 = vmul.f32 %v3256_v1, %v1345_v46 }
 0x39f   : > { %1438 = vmatmul.mubr.f32.vlgmr.msra.gmra.mrb[22].mxu0 %v4302_v24  ;;  %1509 = vmatmul.mubr.f32.vlgmr.msra.gmra.mrb[22].mxu1 %v4302_v24 }
 0x3a0   : > { %1362 = vst [vmem:[%s1361_s9] sm:$0xff] %v1359_v59  ;;  %2945 = vmatpush1.bf16.msra.mxu0 %v3779_v51  ;;  %2977 = vmatpush1.bf16.msra.mxu1 %v3782_v52  ;;  %s2165_s9 = scalar_lea.vmem %s4186_s18, %s2599_s24 }
 0x3a1   : > { %2947 = vmatprep.subr.bf16.mxu0 %v3784_v53  ;;  %2979 = vmatprep.subr.bf16.mxu1 %v3789_v57 }
 0x3a2   : > { %1638 = vmatprep.mubr.f32.mxu0 %v3500_v0  ;;  %1709 = vmatprep.mubr.f32.mxu1 %v3500_v0 }
 0x3a4   : > { %2949 = vmatpush1.bf16.msra.mxu0 %v3802_v2  ;;  %2981 = vmatpush1.bf16.msra.mxu1 %v3806_v3 }
 0x3a5   : > { %2951 = vmatprep.subr.bf16.mxu0 %v3808_v4  ;;  %2983 = vmatprep.subr.bf16.mxu1 %v3814_v8 }
 0x3a8   : > { %2953 = vmatpush1.bf16.msra.mxu0 %v3827_v15  ;;  %2985 = vmatpush1.bf16.msra.mxu1 %v3831_v16 }
 0x3a9   : > { %2955 = vmatprep.subr.bf16.mxu0 %v3833_v17  ;;  %2987 = vmatprep.subr.bf16.mxu1 %v3839_v21 }
 0x3ac   : > { %2957 = vmatpush1.bf16.msra.mxu0 %v3852_v28  ;;  %2989 = vmatpush1.bf16.msra.mxu1 %v3856_v29 }
 0x3ad   : > { %2959 = vmatprep.subr.bf16.mxu0 %v3858_v30  ;;  %2991 = vmatprep.subr.bf16.mxu1 %v3864_v34 }
 0x3b0   : > { %2961 = vmatpush1.bf16.msra.mxu0 %v3877_v42  ;;  %2993 = vmatpush1.bf16.msra.mxu1 %v3882_v44 }
 0x3b1   : > { %2963 = vmatprep.subr.bf16.mxu0 %v3884_v45  ;;  %2995 = vmatprep.subr.bf16.mxu1 %v3890_v49 }
 0x3b4   : > { %2965 = vmatpush1.bf16.msra.mxu0 %v3903_v60  ;;  %2997 = vmatpush1.bf16.msra.mxu1 %v3911_v61 }
 0x3b5   : > { %2967 = vmatprep.subr.bf16.mxu0 %v3913_v62  ;;  %2999 = vmatprep.subr.bf16.mxu1 %v3923_v7 }
 0x3b8   : > { %2969 = vmatpush1.bf16.msra.mxu0 %v3936_v18  ;;  %3001 = vmatpush1.bf16.msra.mxu1 %v3950_v22 }
 0x3b9   : > { %2971 = vmatprep.subr.bf16.mxu0 %v3952_v23  ;;  %3003 = vmatprep.subr.bf16.mxu1 %v3962_v27 }
 0x3bc   : > { %2973 = vmatpush1.bf16.msra.mxu0 %v3977_v36  ;;  %3005 = vmatpush1.bf16.msra.mxu1 %v3991_v39 }
 0x3bd   : > { %3007 = vmatprep.subr.bf16.mxu0 %v3763_v40  ;;  %3039 = vmatprep.subr.bf16.mxu1 %v3767_v43 }
 0x472   : > { %v1439_v35 = vpop.f32.mrb[22].mxu0  ;;  %v1510_v63 = vpop.f32.mrb[22].mxu1 }
 0x473   : > { %v1515_v55 = vadd.f32 %v1439_v35, %v1369_v25  ;;  %v1441_v9 = vpop.f32.mrb[23].mxu0  ;;  %v1512_v56 = vpop.f32.mrb[23].mxu1  ;;  %v1517_v58 = vadd.f32 %v1510_v63, %v1371_v20 }
 0x474   : > { %v1516_v10 = vadd.f32 %v1441_v9, %v1370_v6  ;;  %v1518_v14 = vadd.f32 %v1512_v56, %v1372_v13  ;;  %v3257_v56 = vunpack.i.h.bf16 %v4297_v26  ;;  %v1571_v13 = vld [vmem:[%s1569_s11 + $0x8] sm:$0xff] }
 0x475   : > { %v2574_v11 = vmul.f32 -1.442695, %v1515_v55 }
 0x476   : > { %v2575_v12 = vmul.f32 -1.442695, %v1516_v10  ;;  %v2576_v31 = vmul.f32 -1.442695, %v1518_v14 }
 0x477   : > { %3316 = vpow2.f32 %v2574_v11 }
 0x478   : > { %3318 = vpow2.f32 %v2575_v12 }
 0x479   : > { %3320 = vpow2.f32 %v2576_v31 }
 0x47a   : > { %3322 = vtanh.f32 %v1517_v58 }
 0x481   : > { %v3317_v32 = vpop.eup %3316 }
 0x482   : > { %v3319_v33 = vpop.eup %3318  ;;  %v1522_v5 = vadd.f32 1.0, %v3317_v32 }
 0x483   : > { %v1528_v48 = vadd.f32 1.0, %v3319_v33  ;;  %v3321_v38 = vpop.eup %3320  ;;  %v1573_v33 = vld [vmem:[%s1569_s11 + $0x18] sm:$0xff] }
 0x484   : > { %3324 = vrcp.f32 %v1522_v5  ;;  %v3323_v41 = vpop.eup %3322  ;;  %v1535_v25 = vadd.f32 1.0, %v3321_v38 }
 0x485   : > { %3326 = vrcp.f32 %v1528_v48  ;;  %v1572_v48 = vld [vmem:[%s1569_s11 + $0x10] sm:$0xff]  ;;  %s339_s11 = scalar_lea.vmem %s4517_s6, %s2550_s10 }
 0x486   : > { %3328 = vrcp.f32 %v1535_v25 }
 0x48e   : > { %v3325_v1 = vpop.eup %3324 }
 0x48f   : > { %v3327_v46 = vpop.eup %3326  ;;  %v1543_v59 = vmul.f32 %v3325_v1, %v3323_v41 }
 0x490   : > { %v1542_v35 = vmul.f32 %v3327_v46, %v4292_v54  ;;  %v3329_v6 = vpop.eup %3328 }
 0x492   : > { %v1544_v55 = vadd.f32 %v1543_v59, %v1542_v35 }
 0x494   : > { %3330 = vtanh.f32 %v1544_v55  ;;  %v4344_v63 = vsel %vm1550_vm11, %v1544_v55, %v4292_v54 }
 0x49e   : > { %v3331_v9 = vpop.eup %3330 }
 0x49f   : > { %v1546_v10 = vmul.f32 %v3331_v9, %v3329_v6 }
 0x4a1   : > { %v4350_v11 = vsel %vm1550_vm11, %v1546_v10, %v4302_v24  ;;  %v1560_v12 = vmul.f32 %v3257_v56, %v1546_v10 }
 0x4a2   : > { %1639 = vmatmul.mubr.f32.vlgmr.msra.gmra.mrb[24].mxu0 %v4350_v11  ;;  %1710 = vmatmul.mubr.f32.vlgmr.msra.gmra.mrb[24].mxu1 %v4350_v11 }
 0x4a3   : > { %1563 = vst [vmem:[%s1562_s21] sm:$0xff] %v1560_v12  ;;  %3009 = vmatpush1.bf16.msra.mxu0 %v3779_v51  ;;  %3041 = vmatpush1.bf16.msra.mxu1 %v3782_v52 }
 0x4a4   : > { %3011 = vmatprep.subr.bf16.mxu0 %v3784_v53  ;;  %3043 = vmatprep.subr.bf16.mxu1 %v3789_v57 }
 0x4a5   : > { %1839 = vmatprep.mubr.f32.mxu0 %v3500_v0  ;;  %1910 = vmatprep.mubr.f32.mxu1 %v3500_v0 }
 0x4a7   : > { %3013 = vmatpush1.bf16.msra.mxu0 %v3802_v2  ;;  %3045 = vmatpush1.bf16.msra.mxu1 %v3806_v3 }
 0x4a8   : > { %3015 = vmatprep.subr.bf16.mxu0 %v3808_v4  ;;  %3047 = vmatprep.subr.bf16.mxu1 %v3814_v8 }
 0x4ab   : > { %3017 = vmatpush1.bf16.msra.mxu0 %v3827_v15  ;;  %3049 = vmatpush1.bf16.msra.mxu1 %v3831_v16 }
 0x4ac   : > { %3019 = vmatprep.subr.bf16.mxu0 %v3833_v17  ;;  %3051 = vmatprep.subr.bf16.mxu1 %v3839_v21 }
 0x4af   : > { %3021 = vmatpush1.bf16.msra.mxu0 %v3852_v28  ;;  %3053 = vmatpush1.bf16.msra.mxu1 %v3856_v29 }
 0x4b0   : > { %3023 = vmatprep.subr.bf16.mxu0 %v3858_v30  ;;  %3055 = vmatprep.subr.bf16.mxu1 %v3864_v34 }
 0x4b3   : > { %3025 = vmatpush1.bf16.msra.mxu0 %v3877_v42  ;;  %3057 = vmatpush1.bf16.msra.mxu1 %v3882_v44 }
 0x4b4   : > { %3027 = vmatprep.subr.bf16.mxu0 %v3884_v45  ;;  %3059 = vmatprep.subr.bf16.mxu1 %v3890_v49 }
 0x4b7   : > { %3029 = vmatpush1.bf16.msra.mxu0 %v3903_v60  ;;  %3061 = vmatpush1.bf16.msra.mxu1 %v3911_v61 }
 0x4b8   : > { %3031 = vmatprep.subr.bf16.mxu0 %v3913_v62  ;;  %3063 = vmatprep.subr.bf16.mxu1 %v3923_v7 }
 0x4bb   : > { %3033 = vmatpush1.bf16.msra.mxu0 %v3936_v18  ;;  %3065 = vmatpush1.bf16.msra.mxu1 %v3950_v22 }
 0x4bc   : > { %3035 = vmatprep.subr.bf16.mxu0 %v3952_v23  ;;  %3067 = vmatprep.subr.bf16.mxu1 %v3962_v27 }
 0x4bf   : > { %3037 = vmatpush1.bf16.msra.mxu0 %v3977_v36  ;;  %3069 = vmatpush1.bf16.msra.mxu1 %v3991_v39 }
 0x4c0   : > { %3071 = vmatprep.subr.bf16.mxu0 %v3763_v40  ;;  %3103 = vmatprep.subr.bf16.mxu1 %v3767_v43 }
 0x575   : > { %v1640_v54 = vpop.f32.mrb[24].mxu0  ;;  %v1711_v26 = vpop.f32.mrb[24].mxu1 }
 0x576   : > { %v1716_v24 = vadd.f32 %v1640_v54, %v1570_v19  ;;  %v1642_v14 = vpop.f32.mrb[25].mxu0  ;;  %v1713_v20 = vpop.f32.mrb[25].mxu1  ;;  %v1718_v41 = vadd.f32 %v1711_v26, %v1572_v48 }
 0x577   : > { %v1717_v31 = vadd.f32 %v1642_v14, %v1571_v13  ;;  %v1719_v5 = vadd.f32 %v1713_v20, %v1573_v33  ;;  %v4395_v13 = vpop.permute.xlu1 %3259  ;;  %v1772_v33 = vld [vmem:[%s1770_s8 + $0x8] sm:$0xff] }
 0x578   : > { %v2581_v58 = vmul.f32 -1.442695, %v1716_v24  ;;  %v3261_v14 = vunpack.i.l.bf16 %v4395_v13 }
 0x579   : > { %v2582_v32 = vmul.f32 -1.442695, %v1717_v31  ;;  %v2583_v38 = vmul.f32 -1.442695, %v1719_v5 }
 0x57a   : > { %3332 = vpow2.f32 %v2581_v58 }
 0x57b   : > { %3334 = vpow2.f32 %v2582_v32 }
 0x57c   : > { %3336 = vpow2.f32 %v2583_v38 }
 0x57d   : > { %3338 = vtanh.f32 %v1718_v41 }
 0x584   : > { %v3333_v1 = vpop.eup %3332 }
 0x585   : > { %v3335_v46 = vpop.eup %3334  ;;  %v1723_v59 = vadd.f32 1.0, %v3333_v1 }
 0x586   : > { %v1729_v25 = vadd.f32 1.0, %v3335_v46  ;;  %v3337_v35 = vpop.eup %3336  ;;  %v1774_v46 = vld [vmem:[%s1770_s8 + $0x18] sm:$0xff] }
 0x587   : > { %3340 = vrcp.f32 %v1723_v59  ;;  %v3339_v55 = vpop.eup %3338  ;;  %v1736_v10 = vadd.f32 1.0, %v3337_v35 }
 0x588   : > { %3342 = vrcp.f32 %v1729_v25  ;;  %v1773_v25 = vld [vmem:[%s1770_s8 + $0x10] sm:$0xff] }
 0x589   : > { %3344 = vrcp.f32 %v1736_v10 }
 0x591   : > { %v3341_v6 = vpop.eup %3340 }
 0x592   : > { %v3343_v9 = vpop.eup %3342  ;;  %v1744_v56 = vmul.f32 %v3341_v6, %v3339_v55 }
 0x593   : > { %v1743_v12 = vmul.f32 %v3343_v9, %v4344_v63  ;;  %v3345_v26 = vpop.eup %3344 }
 0x595   : > { %v1745_v19 = vadd.f32 %v1744_v56, %v1743_v12 }
 0x597   : > { %3346 = vtanh.f32 %v1745_v19  ;;  %v4392_v54 = vsel %vm1751_vm12, %v1745_v19, %v4344_v63 }
 0x5a1   : > { %v3347_v24 = vpop.eup %3346 }
 0x5a2   : > { %v1747_v20 = vmul.f32 %v3347_v24, %v3345_v26 }
 0x5a4   : > { %v4400_v31 = vsel %vm1751_vm12, %v1747_v20, %v4350_v11  ;;  %v1761_v58 = vmul.f32 %v3261_v14, %v1747_v20 }
 0x5a5   : > { %1840 = vmatmul.mubr.f32.vlgmr.msra.gmra.mrb[26].mxu0 %v4400_v31  ;;  %1911 = vmatmul.mubr.f32.vlgmr.msra.gmra.mrb[26].mxu1 %v4400_v31 }
 0x5a6   : > { %1764 = vst [vmem:[%s1763_s13] sm:$0xff] %v1761_v58  ;;  %3073 = vmatpush1.bf16.msra.mxu0 %v3779_v51  ;;  %3105 = vmatpush1.bf16.msra.mxu1 %v3782_v52 }
 0x5a7   : > { %3075 = vmatprep.subr.bf16.mxu0 %v3784_v53  ;;  %3107 = vmatprep.subr.bf16.mxu1 %v3789_v57 }
 0x5a8   : > { %2040 = vmatprep.mubr.f32.mxu0 %v3500_v0  ;;  %2111 = vmatprep.mubr.f32.mxu1 %v3500_v0 }
 0x5aa   : > { %3077 = vmatpush1.bf16.msra.mxu0 %v3802_v2  ;;  %3109 = vmatpush1.bf16.msra.mxu1 %v3806_v3 }
 0x5ab   : > { %3079 = vmatprep.subr.bf16.mxu0 %v3808_v4  ;;  %3111 = vmatprep.subr.bf16.mxu1 %v3814_v8 }
 0x5ae   : > { %3081 = vmatpush1.bf16.msra.mxu0 %v3827_v15  ;;  %3113 = vmatpush1.bf16.msra.mxu1 %v3831_v16 }
 0x5af   : > { %3083 = vmatprep.subr.bf16.mxu0 %v3833_v17  ;;  %3115 = vmatprep.subr.bf16.mxu1 %v3839_v21 }
 0x5b2   : > { %3085 = vmatpush1.bf16.msra.mxu0 %v3852_v28  ;;  %3117 = vmatpush1.bf16.msra.mxu1 %v3856_v29 }
 0x5b3   : > { %3087 = vmatprep.subr.bf16.mxu0 %v3858_v30  ;;  %3119 = vmatprep.subr.bf16.mxu1 %v3864_v34 }
 0x5b6   : > { %3089 = vmatpush1.bf16.msra.mxu0 %v3877_v42  ;;  %3121 = vmatpush1.bf16.msra.mxu1 %v3882_v44 }
 0x5b7   : > { %3091 = vmatprep.subr.bf16.mxu0 %v3884_v45  ;;  %3123 = vmatprep.subr.bf16.mxu1 %v3890_v49 }
 0x5ba   : > { %3093 = vmatpush1.bf16.msra.mxu0 %v3903_v60  ;;  %3125 = vmatpush1.bf16.msra.mxu1 %v3911_v61 }
 0x5bb   : > { %3095 = vmatprep.subr.bf16.mxu0 %v3913_v62  ;;  %3127 = vmatprep.subr.bf16.mxu1 %v3923_v7 }
 0x5be   : > { %3097 = vmatpush1.bf16.msra.mxu0 %v3936_v18  ;;  %3129 = vmatpush1.bf16.msra.mxu1 %v3950_v22 }
 0x5bf   : > { %3099 = vmatprep.subr.bf16.mxu0 %v3952_v23  ;;  %3131 = vmatprep.subr.bf16.mxu1 %v3962_v27 }
 0x5c2   : > { %3101 = vmatpush1.bf16.msra.mxu0 %v3977_v36  ;;  %3133 = vmatpush1.bf16.msra.mxu1 %v3991_v39 }
 0x5c3   : > { %3135 = vmatprep.subr.bf16.mxu0 %v3763_v40  ;;  %3167 = vmatprep.subr.bf16.mxu1 %v3767_v43 }
 0x678   : > { %v1841_v63 = vpop.f32.mrb[26].mxu0  ;;  %v1912_v11 = vpop.f32.mrb[26].mxu1 }
 0x679   : > { %v1917_v32 = vadd.f32 %v1841_v63, %v1771_v47  ;;  %v1843_v5 = vpop.f32.mrb[27].mxu0  ;;  %v1914_v48 = vpop.f32.mrb[27].mxu1  ;;  %v1919_v35 = vadd.f32 %v1912_v11, %v1773_v25  ;;  %v3262_v11 = vunpack.i.h.bf16 %v4395_v13 }
 0x67a   : > { %v1918_v38 = vadd.f32 %v1843_v5, %v1772_v33  ;;  %v1920_v59 = vadd.f32 %v1914_v48, %v1774_v46 }
 0x67b   : > { %v2588_v41 = vmul.f32 -1.442695, %v1917_v32 }
 0x67c   : > { %v2589_v1 = vmul.f32 -1.442695, %v1918_v38  ;;  %v2590_v40 = vmul.f32 -1.442695, %v1920_v59 }
 0x67d   : > { %3348 = vpow2.f32 %v2588_v41 }
 0x67e   : > { %3350 = vpow2.f32 %v2589_v1  ;;  %v2174_v1 = vld [vmem:[%s2172_s16 + $0x8] sm:$0xff] }
 0x67f   : > { %3352 = vpow2.f32 %v2590_v40 }
 0x680   : > { %3354 = vtanh.f32 %v1919_v35 }
 0x687   : > { %v3349_v43 = vpop.eup %3348 }
 0x688   : > { %v3351_v55 = vpop.eup %3350  ;;  %v1924_v6 = vadd.f32 1.0, %v3349_v43  ;;  %v2176_v43 = vld [vmem:[%s2172_s16 + $0x18] sm:$0xff] }
 0x689   : > { %v1930_v9 = vadd.f32 1.0, %v3351_v55  ;;  %v3353_v56 = vpop.eup %3352 }
 0x68a   : > { %3356 = vrcp.f32 %v1924_v6  ;;  %v3355_v10 = vpop.eup %3354  ;;  %v1937_v24 = vadd.f32 1.0, %v3353_v56  ;;  %v2175_v6 = vld [vmem:[%s2172_s16 + $0x10] sm:$0xff] }
 0x68b   : > { %3358 = vrcp.f32 %v1930_v9 }
 0x68c   : > { %3360 = vrcp.f32 %v1937_v24 }
 0x694   : > { %v3357_v12 = vpop.eup %3356 }
 0x695   : > { %v3359_v19 = vpop.eup %3358  ;;  %v1945_v26 = vmul.f32 %v3357_v12, %v3355_v10 }
 0x696   : > { %v1944_v14 = vmul.f32 %v3359_v19, %v4392_v54  ;;  %v3361_v47 = vpop.eup %3360 }
 0x698   : > { %v1946_v20 = vadd.f32 %v1945_v26, %v1944_v14 }
 0x69a   : > { %3362 = vtanh.f32 %v1946_v20  ;;  %v4442_v58 = vsel %vm1952_vm13, %v1946_v20, %v4392_v54 }
 0x6a4   : > { %v3363_v63 = vpop.eup %3362 }
 0x6a5   : > { %v1948_v32 = vmul.f32 %v3363_v63, %v3361_v47 }
 0x6a7   : > { %v4448_v33 = vsel %vm1952_vm13, %v1948_v32, %v4400_v31  ;;  %v1962_v5 = vmul.f32 %v3262_v11, %v1948_v32 }
 0x6a8   : > { %2041 = vmatmul.mubr.f32.vlgmr.msra.gmra.mrb[28].mxu0 %v4448_v33  ;;  %2112 = vmatmul.mubr.f32.vlgmr.msra.gmra.mrb[28].mxu1 %v4448_v33 }
 0x6a9   : > { %1965 = vst [vmem:[%s1964_s30] sm:$0xff] %v1962_v5  ;;  %3137 = vmatpush1.bf16.msra.mxu0 %v3779_v51  ;;  %3169 = vmatpush1.bf16.msra.mxu1 %v3782_v52  ;;  %v2353_v5 = vpop.permute.xlu1 %2352 }
 0x6aa   : > { %3139 = vmatprep.subr.bf16.mxu0 %v3784_v53  ;;  %3171 = vmatprep.subr.bf16.mxu1 %v3789_v57  ;;  %v1973_v57 = vld [vmem:[%s1971_s20 + $0x8] sm:$0xff]  ;;  %vm2354_vm15 = vcmp.eq.s32.totalorder %v2353_v5, 1 }
 0x6ab   : > { %2241 = vmatprep.mubr.f32.mxu0 %v3500_v0  ;;  %2312 = vmatprep.mubr.f32.mxu1 %v3500_v0  ;;  %v1972_v0 = vld [vmem:[%s1971_s20] sm:$0xff] }
 0x6ad   : > { %3141 = vmatpush1.bf16.msra.mxu0 %v3802_v2  ;;  %3173 = vmatpush1.bf16.msra.mxu1 %v3806_v3 }
 0x6ae   : > { %3143 = vmatprep.subr.bf16.mxu0 %v3808_v4  ;;  %3175 = vmatprep.subr.bf16.mxu1 %v3814_v8 }
 0x6b1   : > { %3145 = vmatpush1.bf16.msra.mxu0 %v3827_v15  ;;  %3177 = vmatpush1.bf16.msra.mxu1 %v3831_v16  ;;  %v1975_v16 = vld [vmem:[%s1971_s20 + $0x18] sm:$0xff] }
 0x6b2   : > { %3147 = vmatprep.subr.bf16.mxu0 %v3833_v17  ;;  %3179 = vmatprep.subr.bf16.mxu1 %v3839_v21  ;;  %v1974_v21 = vld [vmem:[%s1971_s20 + $0x10] sm:$0xff] }
 0x6b5   : > { %3149 = vmatpush1.bf16.msra.mxu0 %v3852_v28  ;;  %3181 = vmatpush1.bf16.msra.mxu1 %v3856_v29 }
 0x6b6   : > { %3151 = vmatprep.subr.bf16.mxu0 %v3858_v30  ;;  %3183 = vmatprep.subr.bf16.mxu1 %v3864_v34 }
 0x6b9   : > { %3153 = vmatpush1.bf16.msra.mxu0 %v3877_v42  ;;  %3185 = vmatpush1.bf16.msra.mxu1 %v3882_v44 }
 0x6ba   : > { %3155 = vmatprep.subr.bf16.mxu0 %v3884_v45  ;;  %3187 = vmatprep.subr.bf16.mxu1 %v3890_v49 }
 0x6bd   : > { %3157 = vmatpush1.bf16.msra.mxu0 %v3903_v60  ;;  %3189 = vmatpush1.bf16.msra.mxu1 %v3911_v61 }
 0x6be   : > { %3159 = vmatprep.subr.bf16.mxu0 %v3913_v62  ;;  %3191 = vmatprep.subr.bf16.mxu1 %v3923_v7 }
 0x6c1   : > { %3161 = vmatpush1.bf16.msra.mxu0 %v3936_v18  ;;  %3193 = vmatpush1.bf16.msra.mxu1 %v3950_v22 }
 0x6c2   : > { %3163 = vmatprep.subr.bf16.mxu0 %v3952_v23  ;;  %3195 = vmatprep.subr.bf16.mxu1 %v3962_v27  ;;  %v3265_v27 = vpop.permute.xlu0 %3264 }
 0x6c3   : > { %v3266_v50 = vunpack.i.l.bf16 %v3265_v27 }
 0x6c5   : > { %3165 = vmatpush1.bf16.msra.mxu0 %v3977_v36  ;;  %3197 = vmatpush1.bf16.msra.mxu1 %v3991_v39 }
 0x77b   : > { %v2042_v51 = vpop.f32.mrb[28].mxu0  ;;  %v2113_v52 = vpop.f32.mrb[28].mxu1 }
 0x77c   : > { %v2118_v53 = vadd.f32 %v2042_v51, %v1972_v0  ;;  %v2044_v2 = vpop.f32.mrb[29].mxu0  ;;  %v2115_v3 = vpop.f32.mrb[29].mxu1  ;;  %v2120_v29 = vadd.f32 %v2113_v52, %v1974_v21  ;;  %v3267_v51 = vunpack.i.h.bf16 %v3265_v27 }
 0x77d   : > { %v2119_v4 = vadd.f32 %v2044_v2, %v1973_v57  ;;  %v2121_v17 = vadd.f32 %v2115_v3, %v1975_v16 }
 0x77e   : > { %v2595_v8 = vmul.f32 -1.442695, %v2118_v53 }
 0x77f   : > { %v2596_v15 = vmul.f32 -1.442695, %v2119_v4  ;;  %v2597_v28 = vmul.f32 -1.442695, %v2121_v17 }
 0x780   : > { %3364 = vpow2.f32 %v2595_v8 }
 0x781   : > { %3366 = vpow2.f32 %v2596_v15 }
 0x782   : > { %3368 = vpow2.f32 %v2597_v28 }
 0x783   : > { %3370 = vtanh.f32 %v2120_v29 }
 0x78a   : > { %v3365_v30 = vpop.eup %3364 }
 0x78b   : > { %v3367_v34 = vpop.eup %3366  ;;  %v2125_v42 = vadd.f32 1.0, %v3365_v30 }
 0x78c   : > { %v2131_v44 = vadd.f32 1.0, %v3367_v34  ;;  %v3369_v45 = vpop.eup %3368 }
 0x78d   : > { %3372 = vrcp.f32 %v2125_v42  ;;  %v3371_v49 = vpop.eup %3370  ;;  %v2138_v7 = vadd.f32 1.0, %v3369_v45 }
 0x78e   : > { %3374 = vrcp.f32 %v2131_v44 }
 0x78f   : > { %3376 = vrcp.f32 %v2138_v7 }
 0x797   : > { %v3373_v60 = vpop.eup %3372 }
 0x798   : > { %v3375_v61 = vpop.eup %3374  ;;  %v2146_v62 = vmul.f32 %v3373_v60, %v3371_v49 }
 0x799   : > { %v2145_v18 = vmul.f32 %v3375_v61, %v4442_v58  ;;  %v3377_v36 = vpop.eup %3376 }
 0x79b   : > { %v2147_v22 = vadd.f32 %v2146_v62, %v2145_v18 }
 0x79d   : > { %3378 = vtanh.f32 %v2147_v22  ;;  %v2154_v23 = vsel %vm2153_vm14, %v2147_v22, %v4442_v58 }
 0x7a7   : > { %v3379_v39 = vpop.eup %3378 }
 0x7a8   : > { %v2149_v54 = vmul.f32 %v3379_v39, %v3377_v36 }
 0x7aa   : > { %v2156_v13 = vsel %vm2153_vm14, %v2149_v54, %v4448_v33  ;;  %v2163_v31 = vmul.f32 %v3266_v50, %v2149_v54 }
 0x7ab   : > { %2242 = vmatmul.mubr.f32.vlgmr.msra.gmra.mrb[30].mxu0 %v2156_v13  ;;  %2313 = vmatmul.mubr.f32.vlgmr.msra.gmra.mrb[30].mxu1 %v2156_v13 }
 0x7ac   : > { %2166 = vst [vmem:[%s2165_s9] sm:$0xff] %v2163_v31 }
 0x87e   : > { %v2243_v48 = vpop.f32.mrb[30].mxu0  ;;  %v2314_v38 = vpop.f32.mrb[30].mxu1 }
 0x87f   : > { %v2319_v41 = vadd.f32 %v2243_v48, %v2173_v37  ;;  %v2245_v46 = vpop.f32.mrb[31].mxu0  ;;  %v2316_v59 = vpop.f32.mrb[31].mxu1  ;;  %v2321_v56 = vadd.f32 %v2314_v38, %v2175_v6 }
 0x880   : > { %v2320_v25 = vadd.f32 %v2245_v46, %v2174_v1  ;;  %v2322_v55 = vadd.f32 %v2316_v59, %v2176_v43 }
 0x881   : > { %v2602_v40 = vmul.f32 -1.442695, %v2319_v41 }
 0x882   : > { %v2603_v35 = vmul.f32 -1.442695, %v2320_v25  ;;  %v2604_v9 = vmul.f32 -1.442695, %v2322_v55 }
 0x883   : > { %3380 = vpow2.f32 %v2602_v40 }
 0x884   : > { %3382 = vpow2.f32 %v2603_v35 }
 0x885   : > { %3384 = vpow2.f32 %v2604_v9 }
 0x886   : > { %3386 = vtanh.f32 %v2321_v56 }
 0x88d   : > { %v3381_v10 = vpop.eup %3380 }
 0x88e   : > { %v3383_v12 = vpop.eup %3382  ;;  %v2326_v19 = vadd.f32 1.0, %v3381_v10 }
 0x88f   : > { %v2332_v26 = vadd.f32 1.0, %v3383_v12  ;;  %v3385_v24 = vpop.eup %3384 }
 0x890   : > { %3388 = vrcp.f32 %v2326_v19  ;;  %v3387_v14 = vpop.eup %3386  ;;  %v2339_v63 = vadd.f32 1.0, %v3385_v24 }
 0x891   : > { %3390 = vrcp.f32 %v2332_v26 }
 0x892   : > { %3392 = vrcp.f32 %v2339_v63 }
 0x89a   : > { %v3389_v20 = vpop.eup %3388 }
 0x89b   : > { %v3391_v58 = vpop.eup %3390  ;;  %v2347_v47 = vmul.f32 %v3389_v20, %v3387_v14 }
 0x89c   : > { %v2346_v11 = vmul.f32 %v3391_v58, %v2154_v23  ;;  %v3393_v33 = vpop.eup %3392 }
 0x89e   : > { %v2348_v32 = vadd.f32 %v2347_v47, %v2346_v11 }
 0x8a0   : > { %3394 = vtanh.f32 %v2348_v32 }
 0x8aa   : > { %v3395_v0 = vpop.eup %3394 }
 0x8ab   : > { %v2350_v52 = vmul.f32 %v3395_v0, %v3393_v33 }
 0x8ad   : > { %v2357_v53 = vsel %vm2354_vm15, %v2350_v52, %v2156_v13  ;;  %v2364_v57 = vmul.f32 %v3267_v51, %v2350_v52 }
 0x8ae   : > { %2369 = vst [vmem:[%s339_s11] sm:$0xff] %v2357_v53 }
 0x8af   : > { %2367 = vst [vmem:[%s2366_s28] sm:$0xff] %v2364_v57 }
 0x8b0 PF: > { %p20_p3 = scmp.ge.s32.totalorder %s3559_s26, 4   ;;  %s4540_s21 = smov %s3486_s22 }
 0x8b1   : > { %s4541_s22 = smov %s3490_s23  ;;  %s4542_s23 = smov %s3569_s29 }
 0x8b2   : > { %s4543_s24 = smov %s3559_s26  ;;  %22 = sbr.rel (!%p20_p3) target bundleno = 5 (0x5), region = 124 }
 0x8b9   :  { %2405 = vsyncpa [#allocation6], 1 }
 0x8ba   :  { %2407 = vsyncpa [#allocation6 + $0x1], 1 }
 0x8bb   :  { %2408 = vsyncpa [#allocation8], 1 }
 0x8bc   :  { %2410 = vsyncpa [#allocation8 + $0x1], 1 }

</bundles_post_ra>
